<compile_context>
chip_gen: v6e
topology: v6e:2x2x1
jax: 0.10.0
libtpu: 0.0.40
codegen_flags: <defaults>
</compile_context>

<pallas_src>
import numpy as np
import jax
import jax.numpy as jnp
from jax.experimental import pallas as pl
from jax.experimental.pallas import tpu as pltpu


# --------------------------------------------------------------------------
# Kernel: everything lane-dense, five MXU matmuls, no rolls / masks / reshape.
# --------------------------------------------------------------------------
def cnn_kernel(x_ref, s_ref, w1_ref, b1_ref, w2_ref, b2_ref, w3_ref, b3_ref,
               wfc_ref, bfc_ref, out_ref):
    f32 = jnp.float32
    x = x_ref[...]                                            # (bt, L*Cin)

    # F.normalize over the channel dim: per-(sample, position) sum of squares,
    # broadcast back across the Cin lanes of its group via the block-diagonal
    # ones matrix S (MXU), then x * rsqrt(max(ss, 1e-24)) (EUP rsqrt).
    ss = jnp.dot(x * x, s_ref[...], preferred_element_type=f32)
    x = x * jax.lax.rsqrt(jnp.maximum(ss, 1e-24))

    # conv1/2/3 as block-banded matmuls (zero padding baked into the weights).
    h = jnp.maximum(jnp.dot(x, w1_ref[...], preferred_element_type=f32)
                    + b1_ref[...], 0.0)                       # (bt, L*16)
    h = jnp.maximum(jnp.dot(h, w2_ref[...], preferred_element_type=f32)
                    + b2_ref[...], 0.0)                       # (bt, L*32)
    h = jnp.maximum(jnp.dot(h, w3_ref[...], preferred_element_type=f32)
                    + b3_ref[...], 0.0)                       # (bt, L*32)

    # FC straight off the lane-dense activations (weight pre-permuted to the
    # (l*32 + c) order, so no in-kernel reshape / relayout is needed).
    out_ref[...] = (jnp.dot(h, wfc_ref[...], preferred_element_type=f32)
                    + bfc_ref[...])


# --------------------------------------------------------------------------
# One-time, host-side parameter preprocessing (hoisted out of the forward).
# --------------------------------------------------------------------------
def _banded_conv_weight(w, L):
    """torch Conv1d weight (Cout, Cin, 3), padding=1  ->  dense block-banded
    (L*Cin, L*Cout) with Wb[l*Cin+ci, lp*Cout+co] = w[co, ci, l-lp+1]."""
    w = np.asarray(w, np.float32)
    cout, cin, K = w.shape
    wb = np.zeros((L, cin, L, cout), np.float32)
    for k in range(K):
        for lp in range(L):
            l = lp + k - (K // 2)
            if 0 <= l < L:
                wb[l, :, lp, :] = w[:, :, k].T
    return wb.reshape(L * cin, L * cout)


def prepare_params(params, num_epochs):
    L = num_epochs
    cin = params["w1"].shape[1]
    out_dim = params["wfc"].shape[0]
    op = ((out_dim + 127) // 128) * 128          # lane-dense fc output width

    # Block-diagonal ones matrix used for the per-position L2 normalize.
    s = np.kron(np.eye(L, dtype=np.float32), np.ones((cin, cin), np.float32))

    # fc: torch flatten order is (c*L + l); activations are ordered (l*32 + c).
    wfc = np.asarray(params["wfc"], np.float32).reshape(out_dim, 32, L)
    wfc = np.transpose(wfc, (2, 1, 0)).reshape(L * 32, out_dim)
    wfc = np.pad(wfc, ((0, 0), (0, op - out_dim)))
    bfc = np.pad(np.asarray(params["bfc"], np.float32).reshape(1, out_dim),
                 ((0, 0), (0, op - out_dim)))

    # TODO(synk): on v6e/v7x, cast the banded weights to bf16 (f32 accumulate)
    # to halve the resident weight footprint; kept f32 here for exactness.
    prepped = {
        "S": s,
        "W1": _banded_conv_weight(params["w1"], L),
        "B1": np.tile(np.asarray(params["b1"], np.float32), L)[None, :],
        "W2": _banded_conv_weight(params["w2"], L),
        "B2": np.tile(np.asarray(params["b2"], np.float32), L)[None, :],
        "W3": _banded_conv_weight(params["w3"], L),
        "B3": np.tile(np.asarray(params["b3"], np.float32), L)[None, :],
        "WFC": wfc,
        "BFC": bfc,
    }
    return {k: jnp.asarray(v) for k, v in prepped.items()}


# --------------------------------------------------------------------------
# Wrapper
# --------------------------------------------------------------------------
def _choose_batch_tile(B, bt_max=128):
    """Batch tile: multiple of 8, capped at bt_max (VMEM-safe on v5e/v7x),
    shrunk so the grid has >= 4 steps (>= 2 per TC on v7x) when B allows."""
    b8 = ((B + 7) // 8) * 8
    bt = min(bt_max, b8)
    while bt > 8 and b8 // bt < 4:
        bt = max(8, ((bt // 2) + 7) // 8 * 8)
    bp = ((b8 + bt - 1) // bt) * bt
    return bt, bp


def _vmem_limit_bytes(bt, L, cin, op):
    f = 4  # f32
    x_buf = 2 * bt * L * cin * f                      # double-buffered input
    o_buf = 2 * bt * op * f                           # double-buffered output
    w_buf = 2 * f * (L * cin * L * cin + L * cin * L * 16 + L * 16
                     + L * 16 * L * 32 + L * 32 + L * 32 * L * 32 + L * 32
                     + L * 32 * op + op)              # (default double-buffer)
    act = bt * f * (L * cin + L * 16 + 2 * L * 32 + op)  # live intermediates
    need = x_buf + o_buf + w_buf + act
    return int(min(max(2 * need, 16 << 20), 64 << 20))


def onedcnn_forward(x_ncl, prepped, out_dim, bt_max=128):
    """x_ncl: (B, logit_dim, num_epochs) f32 -> (B, out_dim) f32."""
    B, cin, L = x_ncl.shape
    op = prepped["WFC"].shape[1]
    bt, bp = _choose_batch_tile(B, bt_max)

    # Lane-dense input: (B, Cin, L) -> (B, L*Cin), (l-major, c-minor); pad batch.
    x = jnp.transpose(x_ncl, (0, 2, 1)).astype(jnp.float32).reshape(B, L * cin)
    if bp != B:
        x = jnp.concatenate([x, jnp.zeros((bp - B, L * cin), jnp.float32)], 0)

    lcin, l16, l32 = L * cin, L * 16, L * 32
    const = lambda i: (0, 0)
    out = pl.pallas_call(
        cnn_kernel,
        out_shape=jax.ShapeDtypeStruct((bp, op), jnp.float32),
        grid=(bp // bt,),
        in_specs=[
            pl.BlockSpec((bt, lcin), lambda i: (i, 0)),
            pl.BlockSpec((lcin, lcin), const),
            pl.BlockSpec((lcin, l16), const),
            pl.BlockSpec((1, l16), const),
            pl.BlockSpec((l16, l32), const),
            pl.BlockSpec((1, l32), const),
            pl.BlockSpec((l32, l32), const),
            pl.BlockSpec((1, l32), const),
            pl.BlockSpec((l32, op), const),
            pl.BlockSpec((1, op), const),
        ],
        out_specs=pl.BlockSpec((bt, op), lambda i: (i, 0)),
        compiler_params=pltpu.CompilerParams(
            dimension_semantics=("parallel",),
            vmem_limit_bytes=_vmem_limit_bytes(bt, L, cin, op)),
    )(x, prepped["S"], prepped["W1"], prepped["B1"], prepped["W2"],
      prepped["B2"], prepped["W3"], prepped["B3"], prepped["WFC"],
      prepped["BFC"])
    return out[:B, :out_dim]


# --------------------------------------------------------------------------
# Pure-JAX reference and parameter init (for the self-test).
# --------------------------------------------------------------------------
def reference_forward(x_ncl, params):
    x = x_ncl / jnp.maximum(
        jnp.sqrt(jnp.sum(x_ncl * x_ncl, axis=1, keepdims=True)), 1e-12)

    def conv(h, w, b):
        y = jax.lax.conv_general_dilated(
            h, w, window_strides=(1,), padding=((1, 1),),
            dimension_numbers=("NCH", "OIH", "NCH"),
            precision=jax.lax.Precision.HIGHEST)
        return jax.nn.relu(y + b[None, :, None])

    h = conv(x, params["w1"], params["b1"])
    h = conv(h, params["w2"], params["b2"])
    h = conv(h, params["w3"], params["b3"])
    flat = h.reshape(h.shape[0], -1)                   # (B, 32*L), c*L + l
    return jnp.dot(flat, params["wfc"].T,
                   precision=jax.lax.Precision.HIGHEST) + params["bfc"]


def init_params(key, logit_dim, num_epochs, out_dim):
    ks = jax.random.split(key, 8)

    def u(k, shape, fan_in):
        bound = 1.0 / np.sqrt(fan_in)
        return jax.random.uniform(k, shape, jnp.float32, -bound, bound)

    return {
        "w1": u(ks[0], (16, logit_dim, 3), logit_dim * 3),
        "b1": u(ks[1], (16,), logit_dim * 3),
        "w2": u(ks[2], (32, 16, 3), 16 * 3),
        "b2": u(ks[3], (32,), 16 * 3),
        "w3": u(ks[4], (32, 32, 3), 32 * 3),
        "b3": u(ks[5], (32,), 32 * 3),
        "wfc": u(ks[6], (out_dim, 32 * num_epochs), 32 * num_epochs),
        "bfc": u(ks[7], (out_dim,), 32 * num_epochs),
    }
    # TODO(synk): dropout / BatchNorm1d / cluster centers / cos-similarity are
    # unused in the module's forward() and are intentionally not implemented.


if __name__ == "__main__":
    B, logit_dim, num_epochs, out_dim = 2, 4, 16, 64
    key = jax.random.PRNGKey(0)
    kx, kp = jax.random.split(key)
    x = jax.random.normal(kx, (B, logit_dim, num_epochs), jnp.float32)
    params = init_params(kp, logit_dim, num_epochs, out_dim)

    prepped = prepare_params(params, num_epochs)          # hoisted, done once
    out = jax.block_until_ready(onedcnn_forward(x, prepped, out_dim))
    ref = jax.block_until_ready(reference_forward(x, params))

    np.testing.assert_allclose(np.asarray(out), np.asarray(ref),
                               rtol=1e-3, atol=1e-3)
    print("KERNEL_OK")
</pallas_src>

<mosaic_0001>
module attributes {stable_mosaic.version = 11 : i64} {
  func.func @cnn_kernel(%arg0: i32, %arg1: memref<8x64xf32, #tpu.memory_space<vmem>>, %arg2: memref<64x64xf32, #tpu.memory_space<vmem>>, %arg3: memref<64x256xf32, #tpu.memory_space<vmem>>, %arg4: memref<1x256xf32, #tpu.memory_space<vmem>>, %arg5: memref<256x512xf32, #tpu.memory_space<vmem>>, %arg6: memref<1x512xf32, #tpu.memory_space<vmem>>, %arg7: memref<512x512xf32, #tpu.memory_space<vmem>>, %arg8: memref<1x512xf32, #tpu.memory_space<vmem>>, %arg9: memref<512x128xf32, #tpu.memory_space<vmem>>, %arg10: memref<1x128xf32, #tpu.memory_space<vmem>>, %arg11: memref<8x128xf32, #tpu.memory_space<vmem>>) attributes {dimension_semantics = [#tpu.dimension_semantics<parallel>], iteration_bounds = array<i64: 1>, scalar_prefetch = 0 : i64, scratch_operands = 0 : i64, tpu.core_type = #tpu.core_type<tc>, window_params = [{transform_indices = @transform_0, window_bounds = array<i64: 8, 64>}, {pipeline_mode = #tpu.pipeline_mode<synchronous>, transform_indices = @transform_1, window_bounds = array<i64: 64, 64>}, {pipeline_mode = #tpu.pipeline_mode<synchronous>, transform_indices = @transform_2, window_bounds = array<i64: 64, 256>}, {pipeline_mode = #tpu.pipeline_mode<synchronous>, transform_indices = @transform_3, window_bounds = array<i64: 1, 256>}, {pipeline_mode = #tpu.pipeline_mode<synchronous>, transform_indices = @transform_4, window_bounds = array<i64: 256, 512>}, {pipeline_mode = #tpu.pipeline_mode<synchronous>, transform_indices = @transform_5, window_bounds = array<i64: 1, 512>}, {pipeline_mode = #tpu.pipeline_mode<synchronous>, transform_indices = @transform_6, window_bounds = array<i64: 512, 512>}, {pipeline_mode = #tpu.pipeline_mode<synchronous>, transform_indices = @transform_7, window_bounds = array<i64: 1, 512>}, {pipeline_mode = #tpu.pipeline_mode<synchronous>, transform_indices = @transform_8, window_bounds = array<i64: 512, 128>}, {pipeline_mode = #tpu.pipeline_mode<synchronous>, transform_indices = @transform_9, window_bounds = array<i64: 1, 128>}, {transform_indices = @transform_10, window_bounds = array<i64: 8, 128>}]} {
    %c0 = arith.constant 0 : index
    %c0_0 = arith.constant 0 : index
    %0 = vector.load %arg1[%c0, %c0_0] : memref<8x64xf32, #tpu.memory_space<vmem>>, vector<8x64xf32>
    %1 = arith.mulf %0, %0 : vector<8x64xf32>
    %c0_1 = arith.constant 0 : index
    %c0_2 = arith.constant 0 : index
    %2 = vector.load %arg2[%c0_1, %c0_2] : memref<64x64xf32, #tpu.memory_space<vmem>>, vector<64x64xf32>
    %cst = arith.constant dense<0.000000e+00> : vector<8x64xf32>
    %3 = tpu.matmul %1, %2, %cst {dimension_numbers = #tpu.dot_dimension_numbers<[1], [0], [0], [1], [0, 0, 1, 1], [], []>} : vector<8x64xf32>, vector<64x64xf32>, vector<8x64xf32> -> vector<8x64xf32>
    %cst_3 = arith.constant 1.000000e-24 : f32
    %4 = vector.broadcast %cst_3 : f32 to vector<8x64xf32>
    %5 = arith.maximumf %3, %4 : vector<8x64xf32>
    %6 = math.rsqrt %5 : vector<8x64xf32>
    %7 = arith.mulf %0, %6 : vector<8x64xf32>
    %c0_4 = arith.constant 0 : index
    %c0_5 = arith.constant 0 : index
    %8 = vector.load %arg3[%c0_4, %c0_5] : memref<64x256xf32, #tpu.memory_space<vmem>>, vector<64x256xf32>
    %cst_6 = arith.constant dense<0.000000e+00> : vector<8x256xf32>
    %9 = tpu.matmul %7, %8, %cst_6 {dimension_numbers = #tpu.dot_dimension_numbers<[1], [0], [0], [1], [0, 0, 1, 1], [], []>} : vector<8x64xf32>, vector<64x256xf32>, vector<8x256xf32> -> vector<8x256xf32>
    %c0_7 = arith.constant 0 : index
    %c0_8 = arith.constant 0 : index
    %10 = vector.load %arg4[%c0_7, %c0_8] : memref<1x256xf32, #tpu.memory_space<vmem>>, vector<1x256xf32>
    %11 = vector.broadcast %10 : vector<1x256xf32> to vector<8x256xf32>
    %12 = arith.addf %9, %11 : vector<8x256xf32>
    %cst_9 = arith.constant 0.000000e+00 : f32
    %13 = vector.broadcast %cst_9 : f32 to vector<8x256xf32>
    %14 = arith.maximumf %12, %13 : vector<8x256xf32>
    %c0_10 = arith.constant 0 : index
    %c0_11 = arith.constant 0 : index
    %15 = vector.load %arg5[%c0_10, %c0_11] : memref<256x512xf32, #tpu.memory_space<vmem>>, vector<256x512xf32>
    %cst_12 = arith.constant dense<0.000000e+00> : vector<8x512xf32>
    %16 = tpu.matmul %14, %15, %cst_12 {dimension_numbers = #tpu.dot_dimension_numbers<[1], [0], [0], [1], [0, 0, 1, 1], [], []>} : vector<8x256xf32>, vector<256x512xf32>, vector<8x512xf32> -> vector<8x512xf32>
    %c0_13 = arith.constant 0 : index
    %c0_14 = arith.constant 0 : index
    %17 = vector.load %arg6[%c0_13, %c0_14] : memref<1x512xf32, #tpu.memory_space<vmem>>, vector<1x512xf32>
    %18 = vector.broadcast %17 : vector<1x512xf32> to vector<8x512xf32>
    %19 = arith.addf %16, %18 : vector<8x512xf32>
    %cst_15 = arith.constant 0.000000e+00 : f32
    %20 = vector.broadcast %cst_15 : f32 to vector<8x512xf32>
    %21 = arith.maximumf %19, %20 : vector<8x512xf32>
    %c0_16 = arith.constant 0 : index
    %c0_17 = arith.constant 0 : index
    %22 = vector.load %arg7[%c0_16, %c0_17] : memref<512x512xf32, #tpu.memory_space<vmem>>, vector<512x512xf32>
    %cst_18 = arith.constant dense<0.000000e+00> : vector<8x512xf32>
    %23 = tpu.matmul %21, %22, %cst_18 {dimension_numbers = #tpu.dot_dimension_numbers<[1], [0], [0], [1], [0, 0, 1, 1], [], []>} : vector<8x512xf32>, vector<512x512xf32>, vector<8x512xf32> -> vector<8x512xf32>
    %c0_19 = arith.constant 0 : index
    %c0_20 = arith.constant 0 : index
    %24 = vector.load %arg8[%c0_19, %c0_20] : memref<1x512xf32, #tpu.memory_space<vmem>>, vector<1x512xf32>
    %25 = vector.broadcast %24 : vector<1x512xf32> to vector<8x512xf32>
    %26 = arith.addf %23, %25 : vector<8x512xf32>
    %cst_21 = arith.constant 0.000000e+00 : f32
    %27 = vector.broadcast %cst_21 : f32 to vector<8x512xf32>
    %28 = arith.maximumf %26, %27 : vector<8x512xf32>
    %c0_22 = arith.constant 0 : index
    %c0_23 = arith.constant 0 : index
    %29 = vector.load %arg9[%c0_22, %c0_23] : memref<512x128xf32, #tpu.memory_space<vmem>>, vector<512x128xf32>
    %cst_24 = arith.constant dense<0.000000e+00> : vector<8x128xf32>
    %30 = tpu.matmul %28, %29, %cst_24 {dimension_numbers = #tpu.dot_dimension_numbers<[1], [0], [0], [1], [0, 0, 1, 1], [], []>} : vector<8x512xf32>, vector<512x128xf32>, vector<8x128xf32> -> vector<8x128xf32>
    %c0_25 = arith.constant 0 : index
    %c0_26 = arith.constant 0 : index
    %31 = vector.load %arg10[%c0_25, %c0_26] : memref<1x128xf32, #tpu.memory_space<vmem>>, vector<1x128xf32>
    %32 = vector.broadcast %31 : vector<1x128xf32> to vector<8x128xf32>
    %33 = arith.addf %30, %32 : vector<8x128xf32>
    %c0_27 = arith.constant 0 : index
    %c0_28 = arith.constant 0 : index
    %34 = vector.load %arg11[%c0_27, %c0_28] : memref<8x128xf32, #tpu.memory_space<vmem>>, vector<8x128xf32>
    tpu.vector_store %arg11[%c0_27, %c0_28], %33 {strides = array<i32>} : memref<8x128xf32, #tpu.memory_space<vmem>>, vector<8x128xf32>,
    return
  }
  func.func @transform_0(%arg0: i32) -> (i32, i32) {
    %c0_i32 = arith.constant 0 : i32
    %c0_i32_0 = arith.constant 0 : i32
    return %arg0, %c0_i32 : i32, i32
  }
  func.func @transform_1(%arg0: i32) -> (i32, i32) {
    %c0_i32 = arith.constant 0 : i32
    %c0_i32_0 = arith.constant 0 : i32
    %c0_i32_1 = arith.constant 0 : i32
    return %c0_i32, %c0_i32_0 : i32, i32
  }
  func.func @transform_2(%arg0: i32) -> (i32, i32) {
    %c0_i32 = arith.constant 0 : i32
    %c0_i32_0 = arith.constant 0 : i32
    %c0_i32_1 = arith.constant 0 : i32
    return %c0_i32, %c0_i32_0 : i32, i32
  }
  func.func @transform_3(%arg0: i32) -> (i32, i32) {
    %c0_i32 = arith.constant 0 : i32
    %c0_i32_0 = arith.constant 0 : i32
    %c0_i32_1 = arith.constant 0 : i32
    return %c0_i32, %c0_i32_0 : i32, i32
  }
  func.func @transform_4(%arg0: i32) -> (i32, i32) {
    %c0_i32 = arith.constant 0 : i32
    %c0_i32_0 = arith.constant 0 : i32
    %c0_i32_1 = arith.constant 0 : i32
    return %c0_i32, %c0_i32_0 : i32, i32
  }
  func.func @transform_5(%arg0: i32) -> (i32, i32) {
    %c0_i32 = arith.constant 0 : i32
    %c0_i32_0 = arith.constant 0 : i32
    %c0_i32_1 = arith.constant 0 : i32
    return %c0_i32, %c0_i32_0 : i32, i32
  }
  func.func @transform_6(%arg0: i32) -> (i32, i32) {
    %c0_i32 = arith.constant 0 : i32
    %c0_i32_0 = arith.constant 0 : i32
    %c0_i32_1 = arith.constant 0 : i32
    return %c0_i32, %c0_i32_0 : i32, i32
  }
  func.func @transform_7(%arg0: i32) -> (i32, i32) {
    %c0_i32 = arith.constant 0 : i32
    %c0_i32_0 = arith.constant 0 : i32
    %c0_i32_1 = arith.constant 0 : i32
    return %c0_i32, %c0_i32_0 : i32, i32
  }
  func.func @transform_8(%arg0: i32) -> (i32, i32) {
    %c0_i32 = arith.constant 0 : i32
    %c0_i32_0 = arith.constant 0 : i32
    %c0_i32_1 = arith.constant 0 : i32
    return %c0_i32, %c0_i32_0 : i32, i32
  }
  func.func @transform_9(%arg0: i32) -> (i32, i32) {
    %c0_i32 = arith.constant 0 : i32
    %c0_i32_0 = arith.constant 0 : i32
    %c0_i32_1 = arith.constant 0 : i32
    return %c0_i32, %c0_i32_0 : i32, i32
  }
  func.func @transform_10(%arg0: i32) -> (i32, i32) {
    %c0_i32 = arith.constant 0 : i32
    %c0_i32_0 = arith.constant 0 : i32
    return %arg0, %c0_i32 : i32, i32
  }
}

</mosaic_0001>

<bundles_post_ra>
// kernel: tpu_custom_call.1
= control target key start
LH: loop header
LB: loop body
LE: loop exit
PB: predicated region body
PF: predicated region fallthrough
CT: control target
= control target key end

     0   :  { %15 = vsyncpa [#allocation3], 0  ;;  %s1860_s0 = inlined_call_operand.hbm [shape: f32[8,64], index: 0, kind: input, shape index: {}]   ;;  %s1861_s1 = inlined_call_operand.hbm [shape: f32[64,64], index: 1, kind: input, shape index: {}]   ;;  %s1862_s2 = inlined_call_operand.hbm [shape: f32[64,256], index: 2, kind: input, shape index: {}]   ;;  %s1863_s3 = inlined_call_operand.hbm [shape: f32[1,256], index: 3, kind: input, shape index: {}]   ;;  %s1864_s4 = inlined_call_operand.hbm [shape: f32[256,512], index: 4, kind: input, shape index: {}]   ;;  %s1865_s5 = inlined_call_operand.vmem [shape: f32[1,512], index: 5, kind: input, shape index: {}]   ;;  %s1866_s6 = inlined_call_operand.hbm [shape: f32[512,512], index: 6, kind: input, shape index: {}]   ;;  %s1867_s7 = inlined_call_operand.vmem [shape: f32[1,512], index: 7, kind: input, shape index: {}]   ;;  %s1868_s8 = inlined_call_operand.hbm [shape: f32[512,128], index: 8, kind: input, shape index: {}]   ;;  %s1869_s9 = inlined_call_operand.vmem [shape: f32[1,128], index: 9, kind: input, shape index: {}]   ;;  %s1870_s10 = inlined_call_operand.hbm [shape: f32[8,128], index: 10, kind: output, shape index: {}]  }
   0x1   :  { %16 = vsyncpa [#allocation6], 0 }
   0x2   :  { %17 = vsyncpa [#allocation9], 0 }
   0x3   :  { %18 = vsyncpa [#allocation12], 0 }
   0x4   :  { %19 = vsyncpa [#allocation4], 0  ;;  %s1699_s13 = smov [#allocation5]  }
   0x5   :  { %s35_s14 = sshll.u32 %s1699_s13, 4  ;;  %s36_s14 = int_to_ptr.vmem [resolvable:$true] %s35_s14 }
   0x6   :  { %s1537_s15 = scalar_lea.vmem %s36_s14, 1024  ;;  %p1542_p1 = scmp.lt.s32.totalorder %s36_s14, %s36_s14 }
   0x7   :  { %p1538_p0 = scmp.ne.s32.totalorder %s36_s14, %s1537_s15  ;;  %p1543_p2 = scmp.lt.s32.totalorder %s1537_s15, %s1537_s15 }
   0x9   :  { %p1544_p3 = por %p1543_p2, %p1542_p1 }
   0xb   :  { %p1545_p4 = pnand %p1544_p3, %p1538_p0 }
   0xd   :  { %1548 = shalt.err (!%p1545_p4)
}
   0xe   :  { %s1700_s16 = smov 128   ;;  %s1701_s17 = smov 8  }
   0xf   :  { %41 = dma.hbm_to_vmem [thread:$0]  %s1861_s1, 1024, %s36_s14, [#allocation6], %s1700_s16, %s1700_s16, %s1701_s17  }
  0x10   :  { %s1702_s20 = smov [#allocation8]  }
  0x11   :  { %s60_s21 = sshll.u32 %s1702_s20, 4  ;;  %s61_s21 = int_to_ptr.vmem [resolvable:$true] %s60_s21 }
  0x12   :  { %s1557_s22 = scalar_lea.vmem %s61_s21, 32  ;;  %p1562_p6 = scmp.lt.s32.totalorder %s61_s21, %s61_s21 }
  0x13   :  { %p1558_p5 = scmp.ne.s32.totalorder %s61_s21, %s1557_s22  ;;  %p1563_p7 = scmp.lt.s32.totalorder %s1557_s22, %s1557_s22 }
  0x15   :  { %p1564_p8 = por %p1563_p7, %p1562_p6 }
  0x17   :  { %p1565_p9 = pnand %p1564_p8, %p1558_p5 }
  0x19   :  { %1568 = shalt.err (!%p1565_p9)
}
  0x1a   :  { %63 = dma.hbm_to_vmem [thread:$0]  %s1863_s3, 32, %s61_s21, [#allocation9]  }
  0x1b   :  { %s1703_s25 = smov [#allocation11]   ;;  %s1704_s27 = smov [#allocation2]  }
  0x1c   :  { %s83_s26 = sshll.u32 %s1703_s25, 4  ;;  %s26_s28 = sshll.u32 %s1704_s27, 4  ;;  %s84_s26 = int_to_ptr.vmem [resolvable:$true] %s83_s26  ;;  %s27_s28 = int_to_ptr.vmem [resolvable:$true] %s26_s28 }
  0x1d   :  { %s1577_s1 = scalar_lea.vmem %s84_s26, 32768  ;;  %p1582_p11 = scmp.lt.s32.totalorder %s84_s26, %s84_s26 }
  0x1e   :  { %p1578_p10 = scmp.ne.s32.totalorder %s84_s26, %s1577_s1  ;;  %p1583_p12 = scmp.lt.s32.totalorder %s1577_s1, %s1577_s1 }
  0x20   :  { %p1584_p13 = por %p1583_p12, %p1582_p11 }
  0x22   :  { %p1585_p0 = pnand %p1584_p13, %p1578_p10 }
  0x24   :  { %1588 = shalt.err (!%p1585_p0)
}
  0x25   :  { %s1705_s29 = smov 512   ;;  %s1706_s30 = smov 32  }
  0x26   :  { %89 = dma.hbm_to_vmem [thread:$0]  %s1866_s6, 32768, %s84_s26, [#allocation12], %s1705_s29, %s1705_s29, %s1706_s30  }
  0x27   :  { %s1597_s12 = scalar_lea.vmem %s27_s28, 128  ;;  %p1602_p2 = scmp.lt.s32.totalorder %s27_s28, %s27_s28 }
  0x28   :  { %p1598_p1 = scmp.ne.s32.totalorder %s27_s28, %s1597_s12  ;;  %p1603_p3 = scmp.lt.s32.totalorder %s1597_s12, %s1597_s12 }
  0x2a   :  { %p1604_p4 = por %p1603_p3, %p1602_p2 }
  0x2c   :  { %p1605_p5 = pnand %p1604_p4, %p1598_p1 }
  0x2e   :  { %1608 = shalt.err (!%p1605_p5)
}
  0x2f   :  { %29 = dma.hbm_to_vmem [thread:$0]  %s1860_s0, 128, %s27_s28, [#allocation3]  }
  0x30   :  { %s1707_s15 = smov [#allocation7]  }
  0x31   :  { %s47_s18 = sshll.u32 %s1707_s15, 4  ;;  %s48_s18 = int_to_ptr.vmem [resolvable:$true] %s47_s18 }
  0x32   :  { %s1617_s19 = scalar_lea.vmem %s48_s18, 2048  ;;  %p1622_p7 = scmp.lt.s32.totalorder %s48_s18, %s48_s18 }
  0x33   :  { %p1618_p6 = scmp.ne.s32.totalorder %s48_s18, %s1617_s19  ;;  %p1623_p8 = scmp.lt.s32.totalorder %s1617_s19, %s1617_s19 }
  0x35   :  { %p1624_p9 = por %p1623_p8, %p1622_p7 }
  0x37   :  { %p1625_p10 = pnand %p1624_p9, %p1618_p6 }
  0x39   :  { %1628 = shalt.err (!%p1625_p10)
}
  0x3a   :  { %s1708_s6 = smov 256   ;;  %s1709_s20 = smov 16  }
  0x3b   :  { %53 = dma.hbm_to_vmem [thread:$0]  %s1862_s2, 2048, %s48_s18, [#allocation6], %s1708_s6, %s1708_s6, %s1709_s20  }
  0x3c   :  { %s1710_s23 = smov [#allocation10]   ;;  %s1711_s0 = smov [#allocation13]  }
  0x3d   :  { %s69_s24 = sshll.u32 %s1710_s23, 4  ;;  %s97_s25 = sshll.u32 %s1711_s0, 4  ;;  %s70_s24 = int_to_ptr.vmem [resolvable:$true] %s69_s24  ;;  %s98_s25 = int_to_ptr.vmem [resolvable:$true] %s97_s25 }
  0x3e   :  { %s1637_s26 = scalar_lea.vmem %s70_s24, 16384  ;;  %p1642_p12 = scmp.lt.s32.totalorder %s70_s24, %s70_s24 }
  0x3f   :  { %p1638_p11 = scmp.ne.s32.totalorder %s70_s24, %s1637_s26  ;;  %p1643_p13 = scmp.lt.s32.totalorder %s1637_s26, %s1637_s26 }
  0x41   :  { %p1644_p0 = por %p1643_p13, %p1642_p12 }
  0x43   :  { %p1645_p1 = pnand %p1644_p0, %p1638_p11 }
  0x45   :  { %1648 = shalt.err (!%p1645_p1)
}
  0x46   :  { %75 = dma.hbm_to_vmem [thread:$0]  %s1864_s4, 16384, %s70_s24, [#allocation9], %s1705_s29, %s1705_s29, %s1706_s30  }
  0x47   :  { %s1657_s2 = scalar_lea.vmem %s98_s25, 8192  ;;  %p1662_p3 = scmp.lt.s32.totalorder %s98_s25, %s98_s25 }
  0x48   :  { %p1658_p2 = scmp.ne.s32.totalorder %s98_s25, %s1657_s2  ;;  %p1663_p4 = scmp.lt.s32.totalorder %s1657_s2, %s1657_s2 }
  0x4a   :  { %p1664_p5 = por %p1663_p4, %p1662_p3 }
  0x4c   :  { %p1665_p6 = pnand %p1664_p5, %p1658_p2 }
  0x4e   :  { %1668 = shalt.err (!%p1665_p6)
}
  0x4f   :  { %103 = dma.hbm_to_vmem [thread:$0]  %s1868_s8, 8192, %s98_s25, [#allocation12], %s1700_s16, %s1700_s16, %s1701_s17  }
  0x50   :  { %1689 = dma.done.wait [#allocation3], 128  }
  0x51   :  { %1690 = vsyncadd [#allocation3], 4294967168 }
  0x52   :  { %1691 = dma.done.wait [#allocation6], 3072  }
  0x53   :  { %1692 = vsyncadd [#allocation6], 4294964224 }
  0x54   :  { %1693 = dma.done.wait [#allocation9], 16416  }
  0x55   :  { %1694 = vsyncadd [#allocation9], 4294950880 }
  0x56   :  { %1695 = dma.done.wait [#allocation12], 40960  }
  0x57   :  { %1696 = vsyncadd [#allocation12], 4294926336  ;;  %v1712_v0 = vmov 0.0   ;;  %vm1713_vm0 = vmmov 0   ;;  %v136_v1 = vld [vmem:[#allocation5 + $0x38] sm:$0xff]  ;;  %v135_v2 = vld [vmem:[#allocation5 + $0x30] sm:$0xff] }
  0x58   :  { %1492 = vmatprep.subr.mxu0 %v1712_v0  ;;  %1508 = vmatprep.mubr.msk.f32.mxu0 %vm1713_vm0, %v1712_v0  ;;  %v134_v3 = vld [vmem:[#allocation5 + $0x28] sm:$0xff]  ;;  %v133_v4 = vld [vmem:[#allocation5 + $0x20] sm:$0xff]  ;;  %v132_v5 = vld [vmem:[#allocation5 + $0x18] sm:$0xff]  ;;  %vm137_vm1 = vcmask 523264   ;;  %s1714_s29 = smov [#allocation14]  }
  0x59   :  { %309 = vmatprep.mubr.f32.mxu1 %v1712_v0  ;;  %1493 = vmatpush3.msra.mxu0 %v136_v1  ;;  %v131_v6 = vld [vmem:[#allocation5 + $0x10] sm:$0xff]  ;;  %v1803_v7 = vld [vmem:[#allocation2] sm:$0xff]  ;;  %v130_v8 = vld [vmem:[#allocation5 + $0x8] sm:$0xff]  ;;  %s1398_s30 = sshll.u32 %s1714_s29, 4  ;;  %s1399_s30 = int_to_ptr.vmem [resolvable:$true] %s1398_s30 }
  0x5a   :  { %1494 = vmatprep.subr.mxu0 %v1712_v0  ;;  %v129_v9 = vld [vmem:[#allocation5] sm:$0xff]  ;;  %v128_v10 = vmul.f32 %v1803_v7, %v1803_v7  ;;  %v229_v11 = vld [vmem:[#allocation7 + $0x78] sm:$0xff]  ;;  %v228_v12 = vld [vmem:[#allocation7 + $0x70] sm:$0xff]  ;;  %s1669_s3 = scalar_lea.vmem %s1399_s30, 128  ;;  %p1674_p8 = scmp.lt.s32.totalorder %s1399_s30, %s1399_s30 }
  0x5b   :  { %1495 = vmatpush3.msra.mxu0 %v135_v2  ;;  %261 = vmatprep.subr.mxu1 %v229_v11  ;;  %v227_v13 = vld [vmem:[#allocation7 + $0x68] sm:$0xff]  ;;  %v226_v14 = vld [vmem:[#allocation7 + $0x60] sm:$0xff]  ;;  %v225_v15 = vld [vmem:[#allocation7 + $0x58] sm:$0xff]  ;;  %p1670_p7 = scmp.ne.s32.totalorder %s1399_s30, %s1669_s3  ;;  %p1675_p9 = scmp.lt.s32.totalorder %s1669_s3, %s1669_s3 }
  0x5c   :  { %1496 = vmatprep.subr.mxu0 %v1712_v0  ;;  %262 = vmatpush1.msra.mxu1 %v228_v12  ;;  %v224_v16 = vld [vmem:[#allocation7 + $0x50] sm:$0xff]  ;;  %v223_v17 = vld [vmem:[#allocation7 + $0x48] sm:$0xff]  ;;  %v222_v18 = vld [vmem:[#allocation7 + $0x40] sm:$0xff] }
  0x5d   :  { %1497 = vmatpush3.msra.mxu0 %v134_v3  ;;  %263 = vmatprep.subr.mxu1 %v227_v13  ;;  %v221_v19 = vld [vmem:[#allocation7 + $0x38] sm:$0xff]  ;;  %v220_v20 = vld [vmem:[#allocation7 + $0x30] sm:$0xff]  ;;  %v219_v21 = vld [vmem:[#allocation7 + $0x28] sm:$0xff]  ;;  %p1676_p10 = por %p1675_p9, %p1674_p8 }
  0x5e   :  { %1498 = vmatprep.subr.mxu0 %v1712_v0  ;;  %264 = vmatpush1.msra.mxu1 %v226_v14  ;;  %v218_v22 = vld [vmem:[#allocation7 + $0x20] sm:$0xff]  ;;  %v217_v23 = vld [vmem:[#allocation7 + $0x18] sm:$0xff]  ;;  %v216_v24 = vld [vmem:[#allocation7 + $0x10] sm:$0xff] }
  0x5f   :  { %1499 = vmatpush3.msra.mxu0 %v133_v4  ;;  %265 = vmatprep.subr.mxu1 %v225_v15  ;;  %v215_v25 = vld [vmem:[#allocation7 + $0x8] sm:$0xff]  ;;  %v214_v26 = vld [vmem:[#allocation7] sm:$0xff]  ;;  %p1677_p11 = pnand %p1676_p10, %p1670_p7 }
  0x60   :  { %1500 = vmatprep.subr.mxu0 %v1712_v0  ;;  %266 = vmatpush1.msra.mxu1 %v224_v16  ;;  %v379_v27 = vld [vmem:[#allocation10 + $0x1e8] sm:$0xff]  ;;  %v381_v28 = vld [vmem:[#allocation10 + $0x1f8] sm:$0xff]  ;;  %v378_v29 = vld [vmem:[#allocation10 + $0x1e0] sm:$0xff] }
  0x61   :  { %1501 = vmatpush3.msra.mxu0 %v132_v5  ;;  %267 = vmatprep.subr.mxu1 %v223_v17  ;;  %v375_v30 = vld [vmem:[#allocation10 + $0x1c8] sm:$0xff]  ;;  %v374_v31 = vld [vmem:[#allocation10 + $0x1c0] sm:$0xff] }
  0x62   :  { %1502 = vmatprep.subr.mxu0 %v1712_v0  ;;  %268 = vmatpush1.msra.mxu1 %v222_v18  ;;  %v371_v32 = vld [vmem:[#allocation10 + $0x1a8] sm:$0xff]  ;;  %v370_v33 = vld [vmem:[#allocation10 + $0x1a0] sm:$0xff] }
  0x63   :  { %1503 = vmatpush3.msra.mxu0 %v131_v6  ;;  %269 = vmatprep.subr.mxu1 %v221_v19  ;;  %v367_v34 = vld [vmem:[#allocation10 + $0x188] sm:$0xff]  ;;  %v366_v35 = vld [vmem:[#allocation10 + $0x180] sm:$0xff] }
  0x64   :  { %1504 = vmatprep.subr.mxu0 %v1712_v0  ;;  %270 = vmatpush1.msra.mxu1 %v220_v20  ;;  %v363_v36 = vld [vmem:[#allocation10 + $0x168] sm:$0xff]  ;;  %v362_v37 = vld [vmem:[#allocation10 + $0x160] sm:$0xff] }
  0x65   :  { %1505 = vmatpush3.msra.mxu0 %v130_v8  ;;  %271 = vmatprep.subr.mxu1 %v219_v21  ;;  %v359_v38 = vld [vmem:[#allocation10 + $0x148] sm:$0xff]  ;;  %v358_v39 = vld [vmem:[#allocation10 + $0x140] sm:$0xff] }
  0x66   :  { %1506 = vmatprep.subr.mxu0 %v1712_v0  ;;  %272 = vmatpush1.msra.mxu1 %v218_v22  ;;  %v355_v40 = vld [vmem:[#allocation10 + $0x128] sm:$0xff]  ;;  %v354_v41 = vld [vmem:[#allocation10 + $0x120] sm:$0xff] }
  0x67   :  { %1507 = vmatpush3.msra.mxu0 %v129_v9  ;;  %273 = vmatprep.subr.mxu1 %v217_v23  ;;  %v351_v42 = vld [vmem:[#allocation10 + $0x108] sm:$0xff]  ;;  %v350_v43 = vld [vmem:[#allocation10 + $0x100] sm:$0xff] }
  0x68   :  { %1509 = vmatmul.mubr.msk.f32.vlgmr.msra.gmra.mxu0 %vm137_vm1, %v128_v10  ;;  %274 = vmatpush1.msra.mxu1 %v216_v24  ;;  %v347_v44 = vld [vmem:[#allocation10 + $0xe8] sm:$0xff]  ;;  %v346_v45 = vld [vmem:[#allocation10 + $0xe0] sm:$0xff] }
  0x69   :  { %275 = vmatprep.subr.mxu1 %v215_v25  ;;  %468 = vmatprep.subr.mxu0 %v379_v27  ;;  %v343_v46 = vld [vmem:[#allocation10 + $0xc8] sm:$0xff]  ;;  %v342_v47 = vld [vmem:[#allocation10 + $0xc0] sm:$0xff]  ;;  %v377_v27 = vld [vmem:[#allocation10 + $0x1d8] sm:$0xff] }
  0x6a   :  { %276 = vmatpush1.msra.mxu1 %v214_v26  ;;  %469 = vmatpush1.msra.mxu0 %v378_v29  ;;  %v339_v48 = vld [vmem:[#allocation10 + $0xa8] sm:$0xff]  ;;  %v338_v49 = vld [vmem:[#allocation10 + $0xa0] sm:$0xff]  ;;  %v380_v26 = vld [vmem:[#allocation10 + $0x1f0] sm:$0xff] }
  0x6b   :  { %539 = vmatprep.subr.mxu1 %v381_v28  ;;  %470 = vmatprep.subr.mxu0 %v375_v30  ;;  %v335_v50 = vld [vmem:[#allocation10 + $0x88] sm:$0xff]  ;;  %v334_v51 = vld [vmem:[#allocation10 + $0x80] sm:$0xff]  ;;  %v376_v28 = vld [vmem:[#allocation10 + $0x1d0] sm:$0xff] }
  0x6c   :  { %471 = vmatpush1.msra.mxu0 %v374_v31  ;;  %v331_v52 = vld [vmem:[#allocation10 + $0x68] sm:$0xff]  ;;  %v330_v53 = vld [vmem:[#allocation10 + $0x60] sm:$0xff]  ;;  %v373_v29 = vld [vmem:[#allocation10 + $0x1b8] sm:$0xff] }
  0x6d   :  { %472 = vmatprep.subr.mxu0 %v371_v32  ;;  %v327_v54 = vld [vmem:[#allocation10 + $0x48] sm:$0xff]  ;;  %v326_v55 = vld [vmem:[#allocation10 + $0x40] sm:$0xff]  ;;  %v372_v30 = vld [vmem:[#allocation10 + $0x1b0] sm:$0xff] }
  0x6e   :  { %473 = vmatpush1.msra.mxu0 %v370_v33  ;;  %v323_v56 = vld [vmem:[#allocation10 + $0x28] sm:$0xff]  ;;  %v322_v57 = vld [vmem:[#allocation10 + $0x20] sm:$0xff]  ;;  %v369_v31 = vld [vmem:[#allocation10 + $0x198] sm:$0xff] }
  0x6f   :  { %474 = vmatprep.subr.mxu0 %v367_v34  ;;  %v319_v58 = vld [vmem:[#allocation10 + $0x8] sm:$0xff]  ;;  %v318_v59 = vld [vmem:[#allocation10] sm:$0xff]  ;;  %v368_v32 = vld [vmem:[#allocation10 + $0x190] sm:$0xff] }
  0x70   :  { %475 = vmatpush1.msra.mxu0 %v366_v35  ;;  %v443_v60 = vld [vmem:[#allocation10 + $0x3e8] sm:$0xff]  ;;  %v442_v61 = vld [vmem:[#allocation10 + $0x3e0] sm:$0xff]  ;;  %v365_v33 = vld [vmem:[#allocation10 + $0x178] sm:$0xff] }
  0x71   :  { %476 = vmatprep.subr.mxu0 %v363_v36  ;;  %v439_v62 = vld [vmem:[#allocation10 + $0x3c8] sm:$0xff]  ;;  %v438_v63 = vld [vmem:[#allocation10 + $0x3c0] sm:$0xff]  ;;  %v364_v34 = vld [vmem:[#allocation10 + $0x170] sm:$0xff] }
  0x72   :  { %477 = vmatpush1.msra.mxu0 %v362_v37  ;;  %v435_v0 = vld [vmem:[#allocation10 + $0x3a8] sm:$0xff]  ;;  %v434_v1 = vld [vmem:[#allocation10 + $0x3a0] sm:$0xff]  ;;  %v361_v35 = vld [vmem:[#allocation10 + $0x158] sm:$0xff] }
  0x73   :  { %478 = vmatprep.subr.mxu0 %v359_v38  ;;  %v431_v2 = vld [vmem:[#allocation10 + $0x388] sm:$0xff]  ;;  %v430_v3 = vld [vmem:[#allocation10 + $0x380] sm:$0xff]  ;;  %v357_v36 = vld [vmem:[#allocation10 + $0x138] sm:$0xff] }
  0x74   :  { %479 = vmatpush1.msra.mxu0 %v358_v39  ;;  %v427_v4 = vld [vmem:[#allocation10 + $0x368] sm:$0xff]  ;;  %v426_v5 = vld [vmem:[#allocation10 + $0x360] sm:$0xff]  ;;  %v356_v37 = vld [vmem:[#allocation10 + $0x130] sm:$0xff] }
  0x75   :  { %480 = vmatprep.subr.mxu0 %v355_v40  ;;  %v423_v6 = vld [vmem:[#allocation10 + $0x348] sm:$0xff]  ;;  %v422_v8 = vld [vmem:[#allocation10 + $0x340] sm:$0xff]  ;;  %v353_v38 = vld [vmem:[#allocation10 + $0x118] sm:$0xff] }
  0x76   :  { %481 = vmatpush1.msra.mxu0 %v354_v41  ;;  %v419_v9 = vld [vmem:[#allocation10 + $0x328] sm:$0xff]  ;;  %v418_v10 = vld [vmem:[#allocation10 + $0x320] sm:$0xff]  ;;  %v352_v39 = vld [vmem:[#allocation10 + $0x110] sm:$0xff] }
  0x77   :  { %482 = vmatprep.subr.mxu0 %v351_v42  ;;  %v415_v11 = vld [vmem:[#allocation10 + $0x308] sm:$0xff]  ;;  %v414_v12 = vld [vmem:[#allocation10 + $0x300] sm:$0xff]  ;;  %v349_v40 = vld [vmem:[#allocation10 + $0xf8] sm:$0xff] }
  0x78   :  { %483 = vmatpush1.msra.mxu0 %v350_v43  ;;  %v411_v13 = vld [vmem:[#allocation10 + $0x2e8] sm:$0xff]  ;;  %v410_v14 = vld [vmem:[#allocation10 + $0x2e0] sm:$0xff]  ;;  %v348_v41 = vld [vmem:[#allocation10 + $0xf0] sm:$0xff] }
  0x79   :  { %484 = vmatprep.subr.mxu0 %v347_v44  ;;  %v407_v15 = vld [vmem:[#allocation10 + $0x2c8] sm:$0xff]  ;;  %v406_v16 = vld [vmem:[#allocation10 + $0x2c0] sm:$0xff]  ;;  %v345_v42 = vld [vmem:[#allocation10 + $0xd8] sm:$0xff] }
  0x7a   :  { %485 = vmatpush1.msra.mxu0 %v346_v45  ;;  %v403_v17 = vld [vmem:[#allocation10 + $0x2a8] sm:$0xff]  ;;  %v402_v18 = vld [vmem:[#allocation10 + $0x2a0] sm:$0xff]  ;;  %v344_v43 = vld [vmem:[#allocation10 + $0xd0] sm:$0xff] }
  0x7b   :  { %486 = vmatprep.subr.mxu0 %v343_v46  ;;  %v399_v19 = vld [vmem:[#allocation10 + $0x288] sm:$0xff]  ;;  %v398_v20 = vld [vmem:[#allocation10 + $0x280] sm:$0xff]  ;;  %v341_v44 = vld [vmem:[#allocation10 + $0xb8] sm:$0xff] }
  0x7c   :  { %487 = vmatpush1.msra.mxu0 %v342_v47  ;;  %v340_v45 = vld [vmem:[#allocation10 + $0xb0] sm:$0xff]  ;;  %v337_v46 = vld [vmem:[#allocation10 + $0x98] sm:$0xff] }
  0x7d   :  { %488 = vmatprep.subr.mxu0 %v339_v48  ;;  %v336_v47 = vld [vmem:[#allocation10 + $0x90] sm:$0xff]  ;;  %v333_v48 = vld [vmem:[#allocation10 + $0x78] sm:$0xff] }
  0x7e   :  { %489 = vmatpush1.msra.mxu0 %v338_v49  ;;  %v332_v49 = vld [vmem:[#allocation10 + $0x70] sm:$0xff] }
  0x7f   :  { %490 = vmatprep.subr.mxu0 %v335_v50  ;;  %v329_v50 = vld [vmem:[#allocation10 + $0x58] sm:$0xff] }
  0x80   :  { %491 = vmatpush1.msra.mxu0 %v334_v51  ;;  %v328_v51 = vld [vmem:[#allocation10 + $0x50] sm:$0xff] }
  0x81   :  { %492 = vmatprep.subr.mxu0 %v331_v52  ;;  %v325_v52 = vld [vmem:[#allocation10 + $0x38] sm:$0xff] }
  0x82   :  { %493 = vmatpush1.msra.mxu0 %v330_v53  ;;  %v324_v53 = vld [vmem:[#allocation10 + $0x30] sm:$0xff] }
  0x83   :  { %494 = vmatprep.subr.mxu0 %v327_v54  ;;  %v321_v54 = vld [vmem:[#allocation10 + $0x18] sm:$0xff] }
  0x84   :  { %495 = vmatpush1.msra.mxu0 %v326_v55  ;;  %v320_v55 = vld [vmem:[#allocation10 + $0x10] sm:$0xff] }
  0x85   :  { %496 = vmatprep.subr.mxu0 %v323_v56  ;;  %v445_v56 = vld [vmem:[#allocation10 + $0x3f8] sm:$0xff] }
  0x86   :  { %497 = vmatpush1.msra.mxu0 %v322_v57  ;;  %v444_v57 = vld [vmem:[#allocation10 + $0x3f0] sm:$0xff] }
  0x87   :  { %498 = vmatprep.subr.mxu0 %v319_v58  ;;  %v441_v58 = vld [vmem:[#allocation10 + $0x3d8] sm:$0xff] }
  0x88   :  { %499 = vmatpush1.msra.mxu0 %v318_v59  ;;  %v440_v59 = vld [vmem:[#allocation10 + $0x3d0] sm:$0xff] }
  0x89   :  { %500 = vmatprep.subr.mxu0 %v443_v60  ;;  %v437_v60 = vld [vmem:[#allocation10 + $0x3b8] sm:$0xff] }
  0x8a   :  { %501 = vmatpush2.msra.mxu0 %v442_v61  ;;  %v436_v61 = vld [vmem:[#allocation10 + $0x3b0] sm:$0xff] }
  0x8b   :  { %502 = vmatprep.subr.mxu0 %v439_v62  ;;  %v433_v62 = vld [vmem:[#allocation10 + $0x398] sm:$0xff] }
  0x8c   :  { %503 = vmatpush2.msra.mxu0 %v438_v63  ;;  %v432_v63 = vld [vmem:[#allocation10 + $0x390] sm:$0xff] }
  0x8d   :  { %504 = vmatprep.subr.mxu0 %v435_v0  ;;  %v429_v0 = vld [vmem:[#allocation10 + $0x378] sm:$0xff] }
  0x8e   :  { %505 = vmatpush2.msra.mxu0 %v434_v1  ;;  %v428_v1 = vld [vmem:[#allocation10 + $0x370] sm:$0xff] }
  0x8f   :  { %506 = vmatprep.subr.mxu0 %v431_v2  ;;  %v425_v2 = vld [vmem:[#allocation10 + $0x358] sm:$0xff] }
  0x90   :  { %507 = vmatpush2.msra.mxu0 %v430_v3  ;;  %v424_v3 = vld [vmem:[#allocation10 + $0x350] sm:$0xff] }
  0x91   :  { %508 = vmatprep.subr.mxu0 %v427_v4  ;;  %v421_v4 = vld [vmem:[#allocation10 + $0x338] sm:$0xff] }
  0x92   :  { %509 = vmatpush2.msra.mxu0 %v426_v5  ;;  %v420_v5 = vld [vmem:[#allocation10 + $0x330] sm:$0xff] }
  0x93   :  { %510 = vmatprep.subr.mxu0 %v423_v6  ;;  %v417_v6 = vld [vmem:[#allocation10 + $0x318] sm:$0xff] }
  0x94   :  { %511 = vmatpush2.msra.mxu0 %v422_v8  ;;  %v416_v8 = vld [vmem:[#allocation10 + $0x310] sm:$0xff] }
  0x95   :  { %512 = vmatprep.subr.mxu0 %v419_v9  ;;  %v413_v9 = vld [vmem:[#allocation10 + $0x2f8] sm:$0xff] }
  0x96   :  { %513 = vmatpush2.msra.mxu0 %v418_v10  ;;  %v412_v10 = vld [vmem:[#allocation10 + $0x2f0] sm:$0xff] }
  0x97   :  { %514 = vmatprep.subr.mxu0 %v415_v11  ;;  %v409_v11 = vld [vmem:[#allocation10 + $0x2d8] sm:$0xff] }
  0x98   :  { %515 = vmatpush2.msra.mxu0 %v414_v12  ;;  %v408_v12 = vld [vmem:[#allocation10 + $0x2d0] sm:$0xff] }
  0x99   :  { %516 = vmatprep.subr.mxu0 %v411_v13  ;;  %v405_v13 = vld [vmem:[#allocation10 + $0x2b8] sm:$0xff] }
  0x9a   :  { %517 = vmatpush2.msra.mxu0 %v410_v14  ;;  %v404_v14 = vld [vmem:[#allocation10 + $0x2b0] sm:$0xff] }
  0x9b   :  { %518 = vmatprep.subr.mxu0 %v407_v15  ;;  %v401_v15 = vld [vmem:[#allocation10 + $0x298] sm:$0xff] }
  0x9c   :  { %519 = vmatpush2.msra.mxu0 %v406_v16  ;;  %v400_v16 = vld [vmem:[#allocation10 + $0x290] sm:$0xff] }
  0x9d   :  { %520 = vmatprep.subr.mxu0 %v403_v17  ;;  %v395_v17 = vld [vmem:[#allocation10 + $0x268] sm:$0xff] }
  0x9e   :  { %521 = vmatpush2.msra.mxu0 %v402_v18  ;;  %v397_v18 = vld [vmem:[#allocation10 + $0x278] sm:$0xff] }
  0x9f   :  { %522 = vmatprep.subr.mxu0 %v399_v19  ;;  %v394_v19 = vld [vmem:[#allocation10 + $0x260] sm:$0xff] }
  0xa0   :  { %523 = vmatpush2.msra.mxu0 %v398_v20  ;;  %v396_v20 = vld [vmem:[#allocation10 + $0x270] sm:$0xff] }
  0xa1   :  { %524 = vmatprep.subr.mxu0 %v395_v17  ;;  %v770_v17 = vld [vmem:[#allocation11 + $0x4e0] sm:$0xff] }
  0xa2   :  { %525 = vmatpush2.msra.mxu0 %v394_v19  ;;  %v767_v19 = vld [vmem:[#allocation11 + $0x4c8] sm:$0xff] }
 0x128   :  { %v207_v21 = vpop.f32.mrf.mxu0 }
 0x129   :  { %v211_v22 = vmax.f32 %v207_v21, 1e-24  ;;  %v391_v21 = vld [vmem:[#allocation10 + $0x248] sm:$0xff] }
 0x12a   :  { %v1510_v23 = vpop.f32.mrf.mxu0  ;;  %526 = vmatprep.subr.mxu0 %v391_v21  ;;  %v766_v21 = vld [vmem:[#allocation11 + $0x4c0] sm:$0xff] }
 0x12b   :  { %1527 = vrsqrt.f32 %v211_v22  ;;  %v393_v22 = vld [vmem:[#allocation10 + $0x258] sm:$0xff]  ;;  %v390_v23 = vld [vmem:[#allocation10 + $0x240] sm:$0xff] }
 0x12c   :  { %527 = vmatpush2.msra.mxu0 %v390_v23  ;;  %v763_v23 = vld [vmem:[#allocation11 + $0x4a8] sm:$0xff] }
 0x138   :  { %v1528_v24 = vpop.eup %1527 }
 0x139   :  { %v213_v25 = vmul.f32 %v1528_v24, %v1803_v7  ;;  %v360_v7 = vld [vmem:[#allocation10 + $0x150] sm:$0xff] }
 0x13a   :  { %v392_v24 = vld [vmem:[#allocation10 + $0x250] sm:$0xff] }
 0x13b   :  { %1411 = vmatmul.mubr.msk.f32.vlgmr.msra.gmra.mxu1 %vm137_vm1, %v213_v25  ;;  %v387_v25 = vld [vmem:[#allocation10 + $0x228] sm:$0xff] }
 0x13c   :  { %540 = vmatpush1.msra.mxu1 %v380_v26  ;;  %v389_v26 = vld [vmem:[#allocation10 + $0x238] sm:$0xff]  ;;  %528 = vmatprep.subr.mxu0 %v387_v25  ;;  %v762_v25 = vld [vmem:[#allocation11 + $0x4a0] sm:$0xff] }
 0x13d   :  { %541 = vmatprep.subr.mxu1 %v377_v27  ;;  %v386_v27 = vld [vmem:[#allocation10 + $0x220] sm:$0xff] }
 0x13e   :  { %542 = vmatpush1.msra.mxu1 %v376_v28  ;;  %v388_v28 = vld [vmem:[#allocation10 + $0x230] sm:$0xff]  ;;  %529 = vmatpush2.msra.mxu0 %v386_v27  ;;  %v759_v27 = vld [vmem:[#allocation11 + $0x488] sm:$0xff] }
 0x13f   :  { %543 = vmatprep.subr.mxu1 %v373_v29  ;;  %v383_v29 = vld [vmem:[#allocation10 + $0x208] sm:$0xff] }
 0x140   :  { %544 = vmatpush1.msra.mxu1 %v372_v30  ;;  %v385_v30 = vld [vmem:[#allocation10 + $0x218] sm:$0xff]  ;;  %530 = vmatprep.subr.mxu0 %v383_v29  ;;  %v758_v29 = vld [vmem:[#allocation11 + $0x480] sm:$0xff] }
 0x141   :  { %545 = vmatprep.subr.mxu1 %v369_v31  ;;  %v382_v31 = vld [vmem:[#allocation10 + $0x200] sm:$0xff] }
 0x142   :  { %546 = vmatpush1.msra.mxu1 %v368_v32  ;;  %v384_v32 = vld [vmem:[#allocation10 + $0x210] sm:$0xff]  ;;  %531 = vmatpush2.msra.mxu0 %v382_v31  ;;  %v755_v31 = vld [vmem:[#allocation11 + $0x468] sm:$0xff] }
 0x143   :  { %547 = vmatprep.subr.mxu1 %v365_v33  ;;  %v675_v33 = vld [vmem:[#allocation11 + $0x1e8] sm:$0xff] }
 0x144   :  { %548 = vmatpush1.msra.mxu1 %v364_v34  ;;  %v803_v34 = vld [vmem:[#allocation11 + $0x5e8] sm:$0xff]  ;;  %892 = vmatprep.subr.mxu0 %v675_v33  ;;  %v754_v33 = vld [vmem:[#allocation11 + $0x460] sm:$0xff] }
 0x145   :  { %549 = vmatprep.subr.mxu1 %v361_v35  ;;  %v232_v35 = vlaneseq }
 0x146   :  { %550 = vmatpush1.msra.mxu1 %v360_v7 }
 0x147   :  { %551 = vmatprep.subr.mxu1 %v357_v36  ;;  %v1810_v7 = vshrl.u32 %v232_v35, 7  ;;  %v751_v35 = vld [vmem:[#allocation11 + $0x448] sm:$0xff] }
 0x148   :  { %552 = vmatpush1.msra.mxu1 %v356_v37  ;;  %v230_v37 = vld [vmem:[#allocation8] sm:$0x3] }
 0x149   :  { %553 = vmatprep.subr.mxu1 %v353_v38  ;;  %v1813_v36 = vsub.s32 0, %v1810_v7  ;;  %v1816_v38 = vsub.s32 1, %v1810_v7 }
 0x14a   :  { %554 = vmatpush1.msra.mxu1 %v352_v39 }
 0x14b   :  { %555 = vmatprep.subr.mxu1 %v349_v40  ;;  %v235_v39 = vrot.slane %v230_v37, %v1813_v36  ;;  %v239_v40 = vrot.slane %v230_v37, %v1816_v38  ;;  %v622_v37 = vld [vmem:[#allocation11 + $0x40] sm:$0xff] }
 0x14c   :  { %556 = vmatpush1.msra.mxu1 %v348_v41 }
 0x14d   :  { %557 = vmatprep.subr.mxu1 %v345_v42 }
 0x14e   :  { %558 = vmatpush1.msra.mxu1 %v344_v43 }
 0x14f   :  { %559 = vmatprep.subr.mxu1 %v341_v44 }
 0x150   :  { %560 = vmatpush1.msra.mxu1 %v340_v45 }
 0x151   :  { %561 = vmatprep.subr.mxu1 %v337_v46 }
 0x152   :  { %562 = vmatpush1.msra.mxu1 %v336_v47  ;;  %v674_v47 = vld [vmem:[#allocation11 + $0x1e0] sm:$0xff] }
 0x153   :  { %563 = vmatprep.subr.mxu1 %v333_v48  ;;  %v802_v48 = vld [vmem:[#allocation11 + $0x5e0] sm:$0xff] }
 0x154   :  { %564 = vmatpush1.msra.mxu1 %v332_v49  ;;  %v671_v49 = vld [vmem:[#allocation11 + $0x1c8] sm:$0xff] }
 0x155   :  { %565 = vmatprep.subr.mxu1 %v329_v50  ;;  %v799_v50 = vld [vmem:[#allocation11 + $0x5c8] sm:$0xff] }
 0x156   :  { %566 = vmatpush1.msra.mxu1 %v328_v51  ;;  %v670_v51 = vld [vmem:[#allocation11 + $0x1c0] sm:$0xff] }
 0x157   :  { %567 = vmatprep.subr.mxu1 %v325_v52  ;;  %v798_v52 = vld [vmem:[#allocation11 + $0x5c0] sm:$0xff] }
 0x158   :  { %568 = vmatpush1.msra.mxu1 %v324_v53  ;;  %v667_v53 = vld [vmem:[#allocation11 + $0x1a8] sm:$0xff] }
 0x159   :  { %569 = vmatprep.subr.mxu1 %v321_v54  ;;  %v795_v54 = vld [vmem:[#allocation11 + $0x5a8] sm:$0xff] }
 0x15a   :  { %570 = vmatpush1.msra.mxu1 %v320_v55  ;;  %v666_v55 = vld [vmem:[#allocation11 + $0x1a0] sm:$0xff] }
 0x15b   :  { %571 = vmatprep.subr.mxu1 %v445_v56  ;;  %v794_v56 = vld [vmem:[#allocation11 + $0x5a0] sm:$0xff] }
 0x15c   :  { %572 = vmatpush2.msra.mxu1 %v444_v57  ;;  %v663_v57 = vld [vmem:[#allocation11 + $0x188] sm:$0xff] }
 0x15d   :  { %573 = vmatprep.subr.mxu1 %v441_v58  ;;  %v791_v58 = vld [vmem:[#allocation11 + $0x588] sm:$0xff] }
 0x15e   :  { %574 = vmatpush2.msra.mxu1 %v440_v59  ;;  %v662_v59 = vld [vmem:[#allocation11 + $0x180] sm:$0xff] }
 0x15f   :  { %575 = vmatprep.subr.mxu1 %v437_v60  ;;  %v790_v60 = vld [vmem:[#allocation11 + $0x580] sm:$0xff] }
 0x160   :  { %576 = vmatpush2.msra.mxu1 %v436_v61  ;;  %v659_v61 = vld [vmem:[#allocation11 + $0x168] sm:$0xff] }
 0x161   :  { %577 = vmatprep.subr.mxu1 %v433_v62  ;;  %v787_v62 = vld [vmem:[#allocation11 + $0x568] sm:$0xff] }
 0x162   :  { %578 = vmatpush2.msra.mxu1 %v432_v63  ;;  %v658_v63 = vld [vmem:[#allocation11 + $0x160] sm:$0xff] }
 0x163   :  { %579 = vmatprep.subr.mxu1 %v429_v0  ;;  %v786_v0 = vld [vmem:[#allocation11 + $0x560] sm:$0xff] }
 0x164   :  { %580 = vmatpush2.msra.mxu1 %v428_v1  ;;  %v655_v1 = vld [vmem:[#allocation11 + $0x148] sm:$0xff] }
 0x165   :  { %581 = vmatprep.subr.mxu1 %v425_v2  ;;  %v783_v2 = vld [vmem:[#allocation11 + $0x548] sm:$0xff] }
 0x166   :  { %582 = vmatpush2.msra.mxu1 %v424_v3  ;;  %v654_v3 = vld [vmem:[#allocation11 + $0x140] sm:$0xff] }
 0x167   :  { %583 = vmatprep.subr.mxu1 %v421_v4  ;;  %v782_v4 = vld [vmem:[#allocation11 + $0x540] sm:$0xff] }
 0x168   :  { %584 = vmatpush2.msra.mxu1 %v420_v5  ;;  %v651_v5 = vld [vmem:[#allocation11 + $0x128] sm:$0xff] }
 0x169   :  { %585 = vmatprep.subr.mxu1 %v417_v6  ;;  %v779_v6 = vld [vmem:[#allocation11 + $0x528] sm:$0xff] }
 0x16a   :  { %586 = vmatpush2.msra.mxu1 %v416_v8  ;;  %v650_v8 = vld [vmem:[#allocation11 + $0x120] sm:$0xff] }
 0x16b   :  { %587 = vmatprep.subr.mxu1 %v413_v9  ;;  %v778_v9 = vld [vmem:[#allocation11 + $0x520] sm:$0xff] }
 0x16c   :  { %588 = vmatpush2.msra.mxu1 %v412_v10  ;;  %v647_v10 = vld [vmem:[#allocation11 + $0x108] sm:$0xff] }
 0x16d   :  { %589 = vmatprep.subr.mxu1 %v409_v11  ;;  %v775_v11 = vld [vmem:[#allocation11 + $0x508] sm:$0xff] }
 0x16e   :  { %590 = vmatpush2.msra.mxu1 %v408_v12  ;;  %v646_v12 = vld [vmem:[#allocation11 + $0x100] sm:$0xff] }
 0x16f   :  { %591 = vmatprep.subr.mxu1 %v405_v13  ;;  %v774_v13 = vld [vmem:[#allocation11 + $0x500] sm:$0xff] }
 0x170   :  { %592 = vmatpush2.msra.mxu1 %v404_v14  ;;  %v643_v14 = vld [vmem:[#allocation11 + $0xe8] sm:$0xff] }
 0x171   :  { %593 = vmatprep.subr.mxu1 %v401_v15  ;;  %v771_v15 = vld [vmem:[#allocation11 + $0x4e8] sm:$0xff] }
 0x172   :  { %594 = vmatpush2.msra.mxu1 %v400_v16  ;;  %v642_v16 = vld [vmem:[#allocation11 + $0xe0] sm:$0xff] }
 0x173   :  { %595 = vmatprep.subr.mxu1 %v397_v18  ;;  %v639_v18 = vld [vmem:[#allocation11 + $0xc8] sm:$0xff] }
 0x174   :  { %596 = vmatpush2.msra.mxu1 %v396_v20  ;;  %v638_v20 = vld [vmem:[#allocation11 + $0xc0] sm:$0xff] }
 0x175   :  { %597 = vmatprep.subr.mxu1 %v393_v22  ;;  %v635_v22 = vld [vmem:[#allocation11 + $0xa8] sm:$0xff] }
 0x176   :  { %598 = vmatpush2.msra.mxu1 %v392_v24  ;;  %v634_v24 = vld [vmem:[#allocation11 + $0xa0] sm:$0xff] }
 0x177   :  { %599 = vmatprep.subr.mxu1 %v389_v26  ;;  %v631_v26 = vld [vmem:[#allocation11 + $0x88] sm:$0xff] }
 0x178   :  { %600 = vmatpush2.msra.mxu1 %v388_v28  ;;  %v630_v28 = vld [vmem:[#allocation11 + $0x80] sm:$0xff] }
 0x179   :  { %601 = vmatprep.subr.mxu1 %v385_v30  ;;  %v627_v30 = vld [vmem:[#allocation11 + $0x68] sm:$0xff] }
 0x17a   :  { %602 = vmatpush2.msra.mxu1 %v384_v32  ;;  %v626_v32 = vld [vmem:[#allocation11 + $0x60] sm:$0xff] }
 0x17b   :  { %963 = vmatprep.subr.mxu1 %v803_v34  ;;  %v623_v34 = vld [vmem:[#allocation11 + $0x48] sm:$0xff] }
 0x1fb   :  { %v311_v41 = vpop.f32.mrf.mxu1 }
 0x1fc   :  { %v312_v42 = vadd.f32 %v311_v41, %v235_v39  ;;  %v750_v39 = vld [vmem:[#allocation11 + $0x440] sm:$0xff]  ;;  %v747_v41 = vld [vmem:[#allocation11 + $0x428] sm:$0xff] }
 0x1fd   :  { %v313_v43 = vpop.f32.mrf.mxu1 }
 0x1fe   :  { %v314_v44 = vadd.f32 %v313_v43, %v239_v40  ;;  %v316_v46 = vmax.f32 %v312_v42, 0.0  ;;  %v619_v40 = vld [vmem:[#allocation11 + $0x28] sm:$0xff]  ;;  %v618_v42 = vld [vmem:[#allocation11 + $0x20] sm:$0xff] }
 0x1ff   :  { %v746_v43 = vld [vmem:[#allocation11 + $0x420] sm:$0xff] }
 0x200   :  { %v317_v45 = vmax.f32 %v314_v44, 0.0  ;;  %v615_v44 = vld [vmem:[#allocation11 + $0x8] sm:$0xff] }
 0x202   :  { %532 = vmatprep.mubr.f32.mxu0 %v317_v45  ;;  %603 = vmatprep.mubr.f32.mxu1 %v317_v45  ;;  %v743_v45 = vld [vmem:[#allocation11 + $0x408] sm:$0xff] }
 0x203   :  { %533 = vmatmul.mubr.f32.vlgmr.msra.gmra.mxu0 %v316_v46  ;;  %604 = vmatmul.mubr.f32.vlgmr.msra.gmra.mxu1 %v316_v46  ;;  %v614_v46 = vld [vmem:[#allocation11] sm:$0xff] }
 0x204   :  { %893 = vmatpush1.msra.mxu0 %v674_v47  ;;  %964 = vmatpush1.msra.mxu1 %v802_v48  ;;  %v742_v47 = vld [vmem:[#allocation11 + $0x400] sm:$0xff]  ;;  %v739_v48 = vld [vmem:[#allocation11 + $0x3e8] sm:$0xff] }
 0x205   :  { %894 = vmatprep.subr.mxu0 %v671_v49  ;;  %965 = vmatprep.subr.mxu1 %v799_v50  ;;  %v867_v49 = vld [vmem:[#allocation11 + $0x7e8] sm:$0xff]  ;;  %v738_v50 = vld [vmem:[#allocation11 + $0x3e0] sm:$0xff] }
 0x206   :  { %895 = vmatpush1.msra.mxu0 %v670_v51  ;;  %966 = vmatpush1.msra.mxu1 %v798_v52  ;;  %v866_v51 = vld [vmem:[#allocation11 + $0x7e0] sm:$0xff]  ;;  %v735_v52 = vld [vmem:[#allocation11 + $0x3c8] sm:$0xff] }
 0x207   :  { %896 = vmatprep.subr.mxu0 %v667_v53  ;;  %967 = vmatprep.subr.mxu1 %v795_v54  ;;  %v863_v53 = vld [vmem:[#allocation11 + $0x7c8] sm:$0xff]  ;;  %v734_v54 = vld [vmem:[#allocation11 + $0x3c0] sm:$0xff] }
 0x208   :  { %897 = vmatpush1.msra.mxu0 %v666_v55  ;;  %968 = vmatpush1.msra.mxu1 %v794_v56  ;;  %v862_v55 = vld [vmem:[#allocation11 + $0x7c0] sm:$0xff]  ;;  %v731_v56 = vld [vmem:[#allocation11 + $0x3a8] sm:$0xff] }
 0x209   :  { %898 = vmatprep.subr.mxu0 %v663_v57  ;;  %969 = vmatprep.subr.mxu1 %v791_v58  ;;  %v859_v57 = vld [vmem:[#allocation11 + $0x7a8] sm:$0xff]  ;;  %v730_v58 = vld [vmem:[#allocation11 + $0x3a0] sm:$0xff] }
 0x20a   :  { %899 = vmatpush1.msra.mxu0 %v662_v59  ;;  %970 = vmatpush1.msra.mxu1 %v790_v60  ;;  %v858_v59 = vld [vmem:[#allocation11 + $0x7a0] sm:$0xff]  ;;  %v727_v60 = vld [vmem:[#allocation11 + $0x388] sm:$0xff] }
 0x20b   :  { %900 = vmatprep.subr.mxu0 %v659_v61  ;;  %971 = vmatprep.subr.mxu1 %v787_v62  ;;  %v855_v61 = vld [vmem:[#allocation11 + $0x788] sm:$0xff]  ;;  %v726_v62 = vld [vmem:[#allocation11 + $0x380] sm:$0xff] }
 0x20c   :  { %901 = vmatpush1.msra.mxu0 %v658_v63  ;;  %972 = vmatpush1.msra.mxu1 %v786_v0  ;;  %v854_v63 = vld [vmem:[#allocation11 + $0x780] sm:$0xff]  ;;  %v723_v0 = vld [vmem:[#allocation11 + $0x368] sm:$0xff] }
 0x20d   :  { %902 = vmatprep.subr.mxu0 %v655_v1  ;;  %973 = vmatprep.subr.mxu1 %v783_v2  ;;  %v851_v1 = vld [vmem:[#allocation11 + $0x768] sm:$0xff]  ;;  %v722_v2 = vld [vmem:[#allocation11 + $0x360] sm:$0xff] }
 0x20e   :  { %903 = vmatpush1.msra.mxu0 %v654_v3  ;;  %974 = vmatpush1.msra.mxu1 %v782_v4  ;;  %v850_v3 = vld [vmem:[#allocation11 + $0x760] sm:$0xff]  ;;  %v719_v4 = vld [vmem:[#allocation11 + $0x348] sm:$0xff] }
 0x20f   :  { %904 = vmatprep.subr.mxu0 %v651_v5  ;;  %975 = vmatprep.subr.mxu1 %v779_v6  ;;  %v847_v5 = vld [vmem:[#allocation11 + $0x748] sm:$0xff]  ;;  %v718_v6 = vld [vmem:[#allocation11 + $0x340] sm:$0xff] }
 0x210   :  { %905 = vmatpush1.msra.mxu0 %v650_v8  ;;  %976 = vmatpush1.msra.mxu1 %v778_v9  ;;  %v846_v8 = vld [vmem:[#allocation11 + $0x740] sm:$0xff]  ;;  %v715_v9 = vld [vmem:[#allocation11 + $0x328] sm:$0xff] }
 0x211   :  { %906 = vmatprep.subr.mxu0 %v647_v10  ;;  %977 = vmatprep.subr.mxu1 %v775_v11  ;;  %v843_v10 = vld [vmem:[#allocation11 + $0x728] sm:$0xff]  ;;  %v714_v11 = vld [vmem:[#allocation11 + $0x320] sm:$0xff] }
 0x212   :  { %907 = vmatpush1.msra.mxu0 %v646_v12  ;;  %978 = vmatpush1.msra.mxu1 %v774_v13  ;;  %v842_v12 = vld [vmem:[#allocation11 + $0x720] sm:$0xff]  ;;  %v711_v13 = vld [vmem:[#allocation11 + $0x308] sm:$0xff] }
 0x213   :  { %908 = vmatprep.subr.mxu0 %v643_v14  ;;  %979 = vmatprep.subr.mxu1 %v771_v15  ;;  %v839_v14 = vld [vmem:[#allocation11 + $0x708] sm:$0xff]  ;;  %v710_v15 = vld [vmem:[#allocation11 + $0x300] sm:$0xff] }
 0x214   :  { %909 = vmatpush1.msra.mxu0 %v642_v16  ;;  %980 = vmatpush1.msra.mxu1 %v770_v17  ;;  %v838_v16 = vld [vmem:[#allocation11 + $0x700] sm:$0xff]  ;;  %v707_v17 = vld [vmem:[#allocation11 + $0x2e8] sm:$0xff] }
 0x215   :  { %910 = vmatprep.subr.mxu0 %v639_v18  ;;  %981 = vmatprep.subr.mxu1 %v767_v19  ;;  %v835_v18 = vld [vmem:[#allocation11 + $0x6e8] sm:$0xff]  ;;  %v706_v19 = vld [vmem:[#allocation11 + $0x2e0] sm:$0xff] }
 0x216   :  { %911 = vmatpush1.msra.mxu0 %v638_v20  ;;  %982 = vmatpush1.msra.mxu1 %v766_v21  ;;  %v834_v20 = vld [vmem:[#allocation11 + $0x6e0] sm:$0xff]  ;;  %v703_v21 = vld [vmem:[#allocation11 + $0x2c8] sm:$0xff] }
 0x217   :  { %912 = vmatprep.subr.mxu0 %v635_v22  ;;  %983 = vmatprep.subr.mxu1 %v763_v23  ;;  %v831_v22 = vld [vmem:[#allocation11 + $0x6c8] sm:$0xff]  ;;  %v702_v23 = vld [vmem:[#allocation11 + $0x2c0] sm:$0xff] }
 0x218   :  { %913 = vmatpush1.msra.mxu0 %v634_v24  ;;  %984 = vmatpush1.msra.mxu1 %v762_v25  ;;  %v830_v24 = vld [vmem:[#allocation11 + $0x6c0] sm:$0xff]  ;;  %v699_v25 = vld [vmem:[#allocation11 + $0x2a8] sm:$0xff] }
 0x219   :  { %914 = vmatprep.subr.mxu0 %v631_v26  ;;  %985 = vmatprep.subr.mxu1 %v759_v27  ;;  %v827_v26 = vld [vmem:[#allocation11 + $0x6a8] sm:$0xff]  ;;  %v698_v27 = vld [vmem:[#allocation11 + $0x2a0] sm:$0xff] }
 0x21a   :  { %915 = vmatpush1.msra.mxu0 %v630_v28  ;;  %986 = vmatpush1.msra.mxu1 %v758_v29  ;;  %v826_v28 = vld [vmem:[#allocation11 + $0x6a0] sm:$0xff]  ;;  %v695_v29 = vld [vmem:[#allocation11 + $0x288] sm:$0xff] }
 0x21b   :  { %916 = vmatprep.subr.mxu0 %v627_v30  ;;  %987 = vmatprep.subr.mxu1 %v755_v31  ;;  %v823_v30 = vld [vmem:[#allocation11 + $0x688] sm:$0xff]  ;;  %v694_v31 = vld [vmem:[#allocation11 + $0x280] sm:$0xff] }
 0x21c   :  { %917 = vmatpush1.msra.mxu0 %v626_v32  ;;  %988 = vmatpush1.msra.mxu1 %v754_v33  ;;  %v822_v32 = vld [vmem:[#allocation11 + $0x680] sm:$0xff]  ;;  %v691_v33 = vld [vmem:[#allocation11 + $0x268] sm:$0xff] }
 0x21d   :  { %918 = vmatprep.subr.mxu0 %v623_v34  ;;  %989 = vmatprep.subr.mxu1 %v751_v35  ;;  %v819_v34 = vld [vmem:[#allocation11 + $0x668] sm:$0xff]  ;;  %v690_v35 = vld [vmem:[#allocation11 + $0x260] sm:$0xff] }
 0x21e   :  { %919 = vmatpush1.msra.mxu0 %v622_v37  ;;  %990 = vmatpush1.msra.mxu1 %v750_v39  ;;  %v818_v37 = vld [vmem:[#allocation11 + $0x660] sm:$0xff]  ;;  %v687_v39 = vld [vmem:[#allocation11 + $0x248] sm:$0xff] }
 0x21f   :  { %920 = vmatprep.subr.mxu0 %v619_v40  ;;  %991 = vmatprep.subr.mxu1 %v747_v41  ;;  %v815_v40 = vld [vmem:[#allocation11 + $0x648] sm:$0xff]  ;;  %v686_v41 = vld [vmem:[#allocation11 + $0x240] sm:$0xff] }
 0x220   :  { %921 = vmatpush1.msra.mxu0 %v618_v42  ;;  %992 = vmatpush1.msra.mxu1 %v746_v43  ;;  %v814_v42 = vld [vmem:[#allocation11 + $0x640] sm:$0xff]  ;;  %v683_v43 = vld [vmem:[#allocation11 + $0x228] sm:$0xff] }
 0x221   :  { %922 = vmatprep.subr.mxu0 %v615_v44  ;;  %993 = vmatprep.subr.mxu1 %v743_v45  ;;  %v811_v44 = vld [vmem:[#allocation11 + $0x628] sm:$0xff]  ;;  %v682_v45 = vld [vmem:[#allocation11 + $0x220] sm:$0xff] }
 0x222   :  { %923 = vmatpush1.msra.mxu0 %v614_v46  ;;  %994 = vmatpush1.msra.mxu1 %v742_v47  ;;  %v810_v46 = vld [vmem:[#allocation11 + $0x620] sm:$0xff]  ;;  %v679_v47 = vld [vmem:[#allocation11 + $0x208] sm:$0xff] }
 0x223   :  { %924 = vmatprep.subr.mxu0 %v739_v48  ;;  %995 = vmatprep.subr.mxu1 %v867_v49  ;;  %v807_v48 = vld [vmem:[#allocation11 + $0x608] sm:$0xff]  ;;  %v678_v49 = vld [vmem:[#allocation11 + $0x200] sm:$0xff] }
 0x224   :  { %925 = vmatpush2.msra.mxu0 %v738_v50  ;;  %996 = vmatpush2.msra.mxu1 %v866_v51  ;;  %v806_v50 = vld [vmem:[#allocation11 + $0x600] sm:$0xff]  ;;  %v677_v51 = vld [vmem:[#allocation11 + $0x1f8] sm:$0xff] }
 0x225   :  { %926 = vmatprep.subr.mxu0 %v735_v52  ;;  %997 = vmatprep.subr.mxu1 %v863_v53  ;;  %v805_v52 = vld [vmem:[#allocation11 + $0x5f8] sm:$0xff]  ;;  %v458_v53 = vsub.s32 2, %v1810_v7 }
 0x226   :  { %927 = vmatpush2.msra.mxu0 %v734_v54  ;;  %998 = vmatpush2.msra.mxu1 %v862_v55  ;;  %v446_v54 = vld [vmem:[%s1865_s5] sm:$0xf]  ;;  %v462_v55 = vsub.s32 3, %v1810_v7 }
 0x227   :  { %928 = vmatprep.subr.mxu0 %v731_v56  ;;  %999 = vmatprep.subr.mxu1 %v859_v57  ;;  %v451_v56 = vrot.slane %v446_v54, %v1813_v36  ;;  %v459_v57 = vrot.slane %v446_v54, %v458_v53  ;;  %v1412_v7 = vld [vmem:[%s1869_s9] ss:$0 sm:$0xff] }
 0x228   :  { %929 = vmatpush2.msra.mxu0 %v730_v58  ;;  %1000 = vmatpush2.msra.mxu1 %v858_v59  ;;  %v455_v58 = vrot.slane %v446_v54, %v1816_v38  ;;  %v463_v59 = vrot.slane %v446_v54, %v462_v55  ;;  %v633_v54 = vld [vmem:[#allocation11 + $0x98] sm:$0xff] }
 0x229   :  { %930 = vmatprep.subr.mxu0 %v727_v60  ;;  %1001 = vmatprep.subr.mxu1 %v855_v61 }
 0x22a   :  { %931 = vmatpush2.msra.mxu0 %v726_v62  ;;  %1002 = vmatpush2.msra.mxu1 %v854_v63 }
 0x22b   :  { %932 = vmatprep.subr.mxu0 %v723_v0  ;;  %1003 = vmatprep.subr.mxu1 %v851_v1 }
 0x22c   :  { %933 = vmatpush2.msra.mxu0 %v722_v2  ;;  %1004 = vmatpush2.msra.mxu1 %v850_v3 }
 0x22d   :  { %934 = vmatprep.subr.mxu0 %v719_v4  ;;  %1005 = vmatprep.subr.mxu1 %v847_v5 }
 0x22e   :  { %935 = vmatpush2.msra.mxu0 %v718_v6  ;;  %1006 = vmatpush2.msra.mxu1 %v846_v8 }
 0x22f   :  { %936 = vmatprep.subr.mxu0 %v715_v9  ;;  %1007 = vmatprep.subr.mxu1 %v843_v10  ;;  %v676_v9 = vld [vmem:[#allocation11 + $0x1f0] sm:$0xff] }
 0x230   :  { %937 = vmatpush2.msra.mxu0 %v714_v11  ;;  %1008 = vmatpush2.msra.mxu1 %v842_v12  ;;  %v804_v10 = vld [vmem:[#allocation11 + $0x5f0] sm:$0xff]  ;;  %v673_v11 = vld [vmem:[#allocation11 + $0x1d8] sm:$0xff] }
 0x231   :  { %938 = vmatprep.subr.mxu0 %v711_v13  ;;  %1009 = vmatprep.subr.mxu1 %v839_v14  ;;  %v801_v12 = vld [vmem:[#allocation11 + $0x5d8] sm:$0xff]  ;;  %v672_v13 = vld [vmem:[#allocation11 + $0x1d0] sm:$0xff] }
 0x232   :  { %939 = vmatpush2.msra.mxu0 %v710_v15  ;;  %1010 = vmatpush2.msra.mxu1 %v838_v16  ;;  %v800_v14 = vld [vmem:[#allocation11 + $0x5d0] sm:$0xff]  ;;  %v669_v15 = vld [vmem:[#allocation11 + $0x1b8] sm:$0xff] }
 0x233   :  { %940 = vmatprep.subr.mxu0 %v707_v17  ;;  %1011 = vmatprep.subr.mxu1 %v835_v18  ;;  %v797_v16 = vld [vmem:[#allocation11 + $0x5b8] sm:$0xff]  ;;  %v668_v17 = vld [vmem:[#allocation11 + $0x1b0] sm:$0xff] }
 0x234   :  { %941 = vmatpush2.msra.mxu0 %v706_v19  ;;  %1012 = vmatpush2.msra.mxu1 %v834_v20  ;;  %v796_v18 = vld [vmem:[#allocation11 + $0x5b0] sm:$0xff]  ;;  %v665_v19 = vld [vmem:[#allocation11 + $0x198] sm:$0xff] }
 0x235   :  { %942 = vmatprep.subr.mxu0 %v703_v21  ;;  %1013 = vmatprep.subr.mxu1 %v831_v22  ;;  %v793_v20 = vld [vmem:[#allocation11 + $0x598] sm:$0xff]  ;;  %v664_v21 = vld [vmem:[#allocation11 + $0x190] sm:$0xff] }
 0x236   :  { %943 = vmatpush2.msra.mxu0 %v702_v23  ;;  %1014 = vmatpush2.msra.mxu1 %v830_v24  ;;  %v792_v22 = vld [vmem:[#allocation11 + $0x590] sm:$0xff]  ;;  %v661_v23 = vld [vmem:[#allocation11 + $0x178] sm:$0xff] }
 0x237   :  { %944 = vmatprep.subr.mxu0 %v699_v25  ;;  %1015 = vmatprep.subr.mxu1 %v827_v26  ;;  %v789_v24 = vld [vmem:[#allocation11 + $0x578] sm:$0xff]  ;;  %v660_v25 = vld [vmem:[#allocation11 + $0x170] sm:$0xff] }
 0x238   :  { %945 = vmatpush2.msra.mxu0 %v698_v27  ;;  %1016 = vmatpush2.msra.mxu1 %v826_v28  ;;  %v788_v26 = vld [vmem:[#allocation11 + $0x570] sm:$0xff]  ;;  %v657_v27 = vld [vmem:[#allocation11 + $0x158] sm:$0xff] }
 0x239   :  { %946 = vmatprep.subr.mxu0 %v695_v29  ;;  %1017 = vmatprep.subr.mxu1 %v823_v30  ;;  %v785_v28 = vld [vmem:[#allocation11 + $0x558] sm:$0xff]  ;;  %v656_v29 = vld [vmem:[#allocation11 + $0x150] sm:$0xff] }
 0x23a   :  { %947 = vmatpush2.msra.mxu0 %v694_v31  ;;  %1018 = vmatpush2.msra.mxu1 %v822_v32  ;;  %v784_v30 = vld [vmem:[#allocation11 + $0x550] sm:$0xff]  ;;  %v653_v31 = vld [vmem:[#allocation11 + $0x138] sm:$0xff] }
 0x23b   :  { %948 = vmatprep.subr.mxu0 %v691_v33  ;;  %1019 = vmatprep.subr.mxu1 %v819_v34  ;;  %v781_v32 = vld [vmem:[#allocation11 + $0x538] sm:$0xff]  ;;  %v652_v33 = vld [vmem:[#allocation11 + $0x130] sm:$0xff] }
 0x23c   :  { %949 = vmatpush2.msra.mxu0 %v690_v35  ;;  %1020 = vmatpush2.msra.mxu1 %v818_v37  ;;  %v780_v34 = vld [vmem:[#allocation11 + $0x530] sm:$0xff]  ;;  %v649_v35 = vld [vmem:[#allocation11 + $0x118] sm:$0xff] }
 0x23d   :  { %950 = vmatprep.subr.mxu0 %v687_v39  ;;  %1021 = vmatprep.subr.mxu1 %v815_v40  ;;  %v777_v37 = vld [vmem:[#allocation11 + $0x518] sm:$0xff]  ;;  %v648_v39 = vld [vmem:[#allocation11 + $0x110] sm:$0xff] }
 0x23e   :  { %951 = vmatpush2.msra.mxu0 %v686_v41  ;;  %1022 = vmatpush2.msra.mxu1 %v814_v42  ;;  %v776_v40 = vld [vmem:[#allocation11 + $0x510] sm:$0xff]  ;;  %v645_v41 = vld [vmem:[#allocation11 + $0xf8] sm:$0xff] }
 0x23f   :  { %952 = vmatprep.subr.mxu0 %v683_v43  ;;  %1023 = vmatprep.subr.mxu1 %v811_v44  ;;  %v773_v42 = vld [vmem:[#allocation11 + $0x4f8] sm:$0xff]  ;;  %v644_v43 = vld [vmem:[#allocation11 + $0xf0] sm:$0xff] }
 0x240   :  { %953 = vmatpush2.msra.mxu0 %v682_v45  ;;  %1024 = vmatpush2.msra.mxu1 %v810_v46  ;;  %v772_v44 = vld [vmem:[#allocation11 + $0x4f0] sm:$0xff]  ;;  %v641_v45 = vld [vmem:[#allocation11 + $0xd8] sm:$0xff] }
 0x241   :  { %954 = vmatprep.subr.mxu0 %v679_v47  ;;  %1025 = vmatprep.subr.mxu1 %v807_v48  ;;  %v769_v46 = vld [vmem:[#allocation11 + $0x4d8] sm:$0xff]  ;;  %v640_v47 = vld [vmem:[#allocation11 + $0xd0] sm:$0xff] }
 0x242   :  { %955 = vmatpush2.msra.mxu0 %v678_v49  ;;  %1026 = vmatpush2.msra.mxu1 %v806_v50  ;;  %v768_v48 = vld [vmem:[#allocation11 + $0x4d0] sm:$0xff]  ;;  %v637_v49 = vld [vmem:[#allocation11 + $0xb8] sm:$0xff] }
 0x243   :  { %1034 = vmatprep.subr.mxu0 %v677_v51  ;;  %1105 = vmatprep.subr.mxu1 %v805_v52  ;;  %v765_v50 = vld [vmem:[#allocation11 + $0x4b8] sm:$0xff]  ;;  %v636_v51 = vld [vmem:[#allocation11 + $0xb0] sm:$0xff] }
 0x244   :  { %v764_v52 = vld [vmem:[#allocation11 + $0x4b0] sm:$0xff] }
 0x2c3   :  { %v534_v60 = vpop.f32.mrf.mxu0  ;;  %v605_v61 = vpop.f32.mrf.mxu1 }
 0x2c4   :  { %v1831_v62 = vadd.f32 %v534_v60, %v451_v56  ;;  %v1833_v63 = vadd.f32 %v605_v61, %v459_v57  ;;  %v761_v56 = vld [vmem:[#allocation11 + $0x498] sm:$0xff]  ;;  %v632_v57 = vld [vmem:[#allocation11 + $0x90] sm:$0xff] }
 0x2c5   :  { %v536_v0 = vpop.f32.mrf.mxu0  ;;  %v607_v1 = vpop.f32.mrf.mxu1  ;;  %v757_v60 = vld [vmem:[#allocation11 + $0x478] sm:$0xff]  ;;  %v628_v61 = vld [vmem:[#allocation11 + $0x70] sm:$0xff] }
 0x2c6   :  { %v537_v2 = vadd.f32 %v536_v0, %v455_v58  ;;  %v608_v3 = vadd.f32 %v607_v1, %v463_v59  ;;  %v610_v6 = vmax.f32 %v1831_v62, 0.0  ;;  %v612_v8 = vmax.f32 %v1833_v63, 0.0  ;;  %v760_v58 = vld [vmem:[#allocation11 + $0x490] sm:$0xff]  ;;  %v629_v59 = vld [vmem:[#allocation11 + $0x78] sm:$0xff] }
 0x2c7   :  { %v756_v0 = vld [vmem:[#allocation11 + $0x470] sm:$0xff]  ;;  %v625_v1 = vld [vmem:[#allocation11 + $0x58] sm:$0xff] }
 0x2c8   :  { %v611_v4 = vmax.f32 %v537_v2, 0.0  ;;  %v613_v5 = vmax.f32 %v608_v3, 0.0  ;;  %v753_v2 = vld [vmem:[#allocation11 + $0x458] sm:$0xff]  ;;  %v624_v3 = vld [vmem:[#allocation11 + $0x50] sm:$0xff] }
 0x2c9   :  { %v1206_v62 = vld [vmem:[#allocation13 + $0xd0] sm:$0xff]  ;;  %v1243_v63 = vld [vmem:[#allocation13 + $0x1f8] sm:$0xff] }
 0x2ca   :  { %956 = vmatprep.mubr.f32.mxu0 %v611_v4  ;;  %1027 = vmatprep.mubr.f32.mxu1 %v613_v5 }
 0x2cb   :  { %957 = vmatmul.mubr.f32.vlgmr.msra.gmra.mxu0 %v610_v6  ;;  %1028 = vmatmul.mubr.f32.vlgmr.msra.gmra.mxu1 %v612_v8 }
 0x2cc   :  { %1035 = vmatpush1.msra.mxu0 %v676_v9  ;;  %1106 = vmatpush1.msra.mxu1 %v804_v10  ;;  %v749_v9 = vld [vmem:[#allocation11 + $0x438] sm:$0xff]  ;;  %v620_v10 = vld [vmem:[#allocation11 + $0x30] sm:$0xff] }
 0x2cd   :  { %1036 = vmatprep.subr.mxu0 %v673_v11  ;;  %1098 = vmatprep.mubr.f32.mxu0 %v611_v4  ;;  %v752_v4 = vld [vmem:[#allocation11 + $0x450] sm:$0xff] }
 0x2ce   :  { %1107 = vmatprep.subr.mxu1 %v801_v12  ;;  %1169 = vmatprep.mubr.f32.mxu1 %v613_v5  ;;  %v621_v5 = vld [vmem:[#allocation11 + $0x38] sm:$0xff]  ;;  %v748_v11 = vld [vmem:[#allocation11 + $0x430] sm:$0xff] }
 0x2cf   :  { %1037 = vmatpush1.msra.mxu0 %v672_v13  ;;  %1108 = vmatpush1.msra.mxu1 %v800_v14  ;;  %v617_v12 = vld [vmem:[#allocation11 + $0x18] sm:$0xff]  ;;  %v616_v14 = vld [vmem:[#allocation11 + $0x10] sm:$0xff] }
 0x2d0   :  { %1038 = vmatprep.subr.mxu0 %v669_v15  ;;  %1109 = vmatprep.subr.mxu1 %v797_v16  ;;  %v745_v13 = vld [vmem:[#allocation11 + $0x418] sm:$0xff]  ;;  %v744_v15 = vld [vmem:[#allocation11 + $0x410] sm:$0xff] }
 0x2d1   :  { %1039 = vmatpush1.msra.mxu0 %v668_v17  ;;  %1110 = vmatpush1.msra.mxu1 %v796_v18  ;;  %v741_v16 = vld [vmem:[#allocation11 + $0x3f8] sm:$0xff]  ;;  %v740_v18 = vld [vmem:[#allocation11 + $0x3f0] sm:$0xff] }
 0x2d2   :  { %1040 = vmatprep.subr.mxu0 %v665_v19  ;;  %1111 = vmatprep.subr.mxu1 %v793_v20  ;;  %v869_v17 = vld [vmem:[#allocation11 + $0x7f8] sm:$0xff]  ;;  %v868_v19 = vld [vmem:[#allocation11 + $0x7f0] sm:$0xff] }
 0x2d3   :  { %1041 = vmatpush1.msra.mxu0 %v664_v21  ;;  %1112 = vmatpush1.msra.mxu1 %v792_v22  ;;  %v737_v20 = vld [vmem:[#allocation11 + $0x3d8] sm:$0xff]  ;;  %v736_v22 = vld [vmem:[#allocation11 + $0x3d0] sm:$0xff] }
 0x2d4   :  { %1042 = vmatprep.subr.mxu0 %v661_v23  ;;  %1113 = vmatprep.subr.mxu1 %v789_v24  ;;  %v865_v21 = vld [vmem:[#allocation11 + $0x7d8] sm:$0xff]  ;;  %v864_v23 = vld [vmem:[#allocation11 + $0x7d0] sm:$0xff] }
 0x2d5   :  { %1043 = vmatpush1.msra.mxu0 %v660_v25  ;;  %1114 = vmatpush1.msra.mxu1 %v788_v26  ;;  %v733_v24 = vld [vmem:[#allocation11 + $0x3b8] sm:$0xff]  ;;  %v732_v26 = vld [vmem:[#allocation11 + $0x3b0] sm:$0xff] }
 0x2d6   :  { %1044 = vmatprep.subr.mxu0 %v657_v27  ;;  %1115 = vmatprep.subr.mxu1 %v785_v28  ;;  %v861_v25 = vld [vmem:[#allocation11 + $0x7b8] sm:$0xff]  ;;  %v860_v27 = vld [vmem:[#allocation11 + $0x7b0] sm:$0xff] }
 0x2d7   :  { %1045 = vmatpush1.msra.mxu0 %v656_v29  ;;  %1116 = vmatpush1.msra.mxu1 %v784_v30  ;;  %v729_v28 = vld [vmem:[#allocation11 + $0x398] sm:$0xff]  ;;  %v728_v30 = vld [vmem:[#allocation11 + $0x390] sm:$0xff] }
 0x2d8   :  { %1046 = vmatprep.subr.mxu0 %v653_v31  ;;  %1117 = vmatprep.subr.mxu1 %v781_v32  ;;  %v857_v29 = vld [vmem:[#allocation11 + $0x798] sm:$0xff]  ;;  %v856_v31 = vld [vmem:[#allocation11 + $0x790] sm:$0xff] }
 0x2d9   :  { %1047 = vmatpush1.msra.mxu0 %v652_v33  ;;  %1118 = vmatpush1.msra.mxu1 %v780_v34  ;;  %v725_v32 = vld [vmem:[#allocation11 + $0x378] sm:$0xff]  ;;  %v724_v34 = vld [vmem:[#allocation11 + $0x370] sm:$0xff] }
 0x2da   :  { %1048 = vmatprep.subr.mxu0 %v649_v35  ;;  %1119 = vmatprep.subr.mxu1 %v777_v37  ;;  %v853_v33 = vld [vmem:[#allocation11 + $0x778] sm:$0xff]  ;;  %v852_v35 = vld [vmem:[#allocation11 + $0x770] sm:$0xff] }
 0x2db   :  { %1049 = vmatpush1.msra.mxu0 %v648_v39  ;;  %1120 = vmatpush1.msra.mxu1 %v776_v40  ;;  %v721_v37 = vld [vmem:[#allocation11 + $0x358] sm:$0xff]  ;;  %v720_v40 = vld [vmem:[#allocation11 + $0x350] sm:$0xff] }
 0x2dc   :  { %1050 = vmatprep.subr.mxu0 %v645_v41  ;;  %1121 = vmatprep.subr.mxu1 %v773_v42  ;;  %v849_v39 = vld [vmem:[#allocation11 + $0x758] sm:$0xff]  ;;  %v848_v41 = vld [vmem:[#allocation11 + $0x750] sm:$0xff] }
 0x2dd   :  { %1051 = vmatpush1.msra.mxu0 %v644_v43  ;;  %1122 = vmatpush1.msra.mxu1 %v772_v44  ;;  %v717_v42 = vld [vmem:[#allocation11 + $0x338] sm:$0xff]  ;;  %v716_v44 = vld [vmem:[#allocation11 + $0x330] sm:$0xff] }
 0x2de   :  { %1052 = vmatprep.subr.mxu0 %v641_v45  ;;  %1123 = vmatprep.subr.mxu1 %v769_v46  ;;  %v845_v43 = vld [vmem:[#allocation11 + $0x738] sm:$0xff]  ;;  %v844_v45 = vld [vmem:[#allocation11 + $0x730] sm:$0xff] }
 0x2df   :  { %1053 = vmatpush1.msra.mxu0 %v640_v47  ;;  %1124 = vmatpush1.msra.mxu1 %v768_v48  ;;  %v713_v46 = vld [vmem:[#allocation11 + $0x318] sm:$0xff]  ;;  %v712_v48 = vld [vmem:[#allocation11 + $0x310] sm:$0xff] }
 0x2e0   :  { %1054 = vmatprep.subr.mxu0 %v637_v49  ;;  %1125 = vmatprep.subr.mxu1 %v765_v50  ;;  %v841_v47 = vld [vmem:[#allocation11 + $0x718] sm:$0xff]  ;;  %v840_v49 = vld [vmem:[#allocation11 + $0x710] sm:$0xff] }
 0x2e1   :  { %1055 = vmatpush1.msra.mxu0 %v636_v51  ;;  %1126 = vmatpush1.msra.mxu1 %v764_v52  ;;  %v709_v50 = vld [vmem:[#allocation11 + $0x2f8] sm:$0xff]  ;;  %v708_v52 = vld [vmem:[#allocation11 + $0x2f0] sm:$0xff] }
 0x2e2   :  { %1056 = vmatprep.subr.mxu0 %v633_v54  ;;  %1127 = vmatprep.subr.mxu1 %v761_v56  ;;  %v837_v51 = vld [vmem:[#allocation11 + $0x6f8] sm:$0xff]  ;;  %v836_v54 = vld [vmem:[#allocation11 + $0x6f0] sm:$0xff] }
 0x2e3   :  { %1057 = vmatpush1.msra.mxu0 %v632_v57  ;;  %1128 = vmatpush1.msra.mxu1 %v760_v58  ;;  %v705_v56 = vld [vmem:[#allocation11 + $0x2d8] sm:$0xff]  ;;  %v704_v58 = vld [vmem:[#allocation11 + $0x2d0] sm:$0xff] }
 0x2e4   :  { %1058 = vmatprep.subr.mxu0 %v629_v59  ;;  %1129 = vmatprep.subr.mxu1 %v757_v60  ;;  %v833_v57 = vld [vmem:[#allocation11 + $0x6d8] sm:$0xff]  ;;  %v832_v59 = vld [vmem:[#allocation11 + $0x6d0] sm:$0xff] }
 0x2e5   :  { %1059 = vmatpush1.msra.mxu0 %v628_v61  ;;  %1130 = vmatpush1.msra.mxu1 %v756_v0  ;;  %v701_v60 = vld [vmem:[#allocation11 + $0x2b8] sm:$0xff]  ;;  %v700_v0 = vld [vmem:[#allocation11 + $0x2b0] sm:$0xff] }
 0x2e6   :  { %1060 = vmatprep.subr.mxu0 %v625_v1  ;;  %1131 = vmatprep.subr.mxu1 %v753_v2  ;;  %v829_v61 = vld [vmem:[#allocation11 + $0x6b8] sm:$0xff]  ;;  %v828_v1 = vld [vmem:[#allocation11 + $0x6b0] sm:$0xff] }
 0x2e7   :  { %1061 = vmatpush1.msra.mxu0 %v624_v3  ;;  %1132 = vmatpush1.msra.mxu1 %v752_v4  ;;  %v697_v2 = vld [vmem:[#allocation11 + $0x298] sm:$0xff]  ;;  %v696_v4 = vld [vmem:[#allocation11 + $0x290] sm:$0xff] }
 0x2e8   :  { %1062 = vmatprep.subr.mxu0 %v621_v5  ;;  %1133 = vmatprep.subr.mxu1 %v749_v9  ;;  %v825_v3 = vld [vmem:[#allocation11 + $0x698] sm:$0xff]  ;;  %v824_v5 = vld [vmem:[#allocation11 + $0x690] sm:$0xff] }
 0x2e9   :  { %1063 = vmatpush1.msra.mxu0 %v620_v10  ;;  %1134 = vmatpush1.msra.mxu1 %v748_v11  ;;  %v693_v9 = vld [vmem:[#allocation11 + $0x278] sm:$0xff]  ;;  %v692_v11 = vld [vmem:[#allocation11 + $0x270] sm:$0xff] }
 0x2ea   :  { %1064 = vmatprep.subr.mxu0 %v617_v12  ;;  %1135 = vmatprep.subr.mxu1 %v745_v13  ;;  %v821_v10 = vld [vmem:[#allocation11 + $0x678] sm:$0xff]  ;;  %v820_v12 = vld [vmem:[#allocation11 + $0x670] sm:$0xff] }
 0x2eb   :  { %1065 = vmatpush1.msra.mxu0 %v616_v14  ;;  %1136 = vmatpush1.msra.mxu1 %v744_v15  ;;  %v689_v13 = vld [vmem:[#allocation11 + $0x258] sm:$0xff]  ;;  %v688_v15 = vld [vmem:[#allocation11 + $0x250] sm:$0xff] }
 0x2ec   :  { %1066 = vmatprep.subr.mxu0 %v741_v16  ;;  %1137 = vmatprep.subr.mxu1 %v869_v17  ;;  %v817_v14 = vld [vmem:[#allocation11 + $0x658] sm:$0xff]  ;;  %v816_v16 = vld [vmem:[#allocation11 + $0x650] sm:$0xff] }
 0x2ed   :  { %1067 = vmatpush2.msra.mxu0 %v740_v18  ;;  %1138 = vmatpush2.msra.mxu1 %v868_v19  ;;  %v685_v17 = vld [vmem:[#allocation11 + $0x238] sm:$0xff]  ;;  %v684_v19 = vld [vmem:[#allocation11 + $0x230] sm:$0xff] }
 0x2ee   :  { %1068 = vmatprep.subr.mxu0 %v737_v20  ;;  %1139 = vmatprep.subr.mxu1 %v865_v21  ;;  %v813_v18 = vld [vmem:[#allocation11 + $0x638] sm:$0xff]  ;;  %v812_v20 = vld [vmem:[#allocation11 + $0x630] sm:$0xff] }
 0x2ef   :  { %1069 = vmatpush2.msra.mxu0 %v736_v22  ;;  %1140 = vmatpush2.msra.mxu1 %v864_v23  ;;  %v681_v21 = vld [vmem:[#allocation11 + $0x218] sm:$0xff]  ;;  %v680_v23 = vld [vmem:[#allocation11 + $0x210] sm:$0xff] }
 0x2f0   :  { %1070 = vmatprep.subr.mxu0 %v733_v24  ;;  %1141 = vmatprep.subr.mxu1 %v861_v25  ;;  %v809_v22 = vld [vmem:[#allocation11 + $0x618] sm:$0xff]  ;;  %v808_v24 = vld [vmem:[#allocation11 + $0x610] sm:$0xff] }
 0x2f1   :  { %1071 = vmatpush2.msra.mxu0 %v732_v26  ;;  %1142 = vmatpush2.msra.mxu1 %v860_v27  ;;  %v1211_v25 = vld [vmem:[#allocation13 + $0xf8] sm:$0xff]  ;;  %v1210_v27 = vld [vmem:[#allocation13 + $0xf0] sm:$0xff] }
 0x2f2   :  { %1072 = vmatprep.subr.mxu0 %v729_v28  ;;  %1143 = vmatprep.subr.mxu1 %v857_v29  ;;  %v1195_v26 = vld [vmem:[#allocation13 + $0x78] sm:$0xff]  ;;  %v1194_v28 = vld [vmem:[#allocation13 + $0x70] sm:$0xff]  ;;  %v1209_v29 = vld [vmem:[#allocation13 + $0xe8] sm:$0xff] }
 0x2f3   :  { %1073 = vmatpush2.msra.mxu0 %v728_v30  ;;  %1144 = vmatpush2.msra.mxu1 %v856_v31  ;;  %v1193_v30 = vld [vmem:[#allocation13 + $0x68] sm:$0xff]  ;;  %v1208_v31 = vld [vmem:[#allocation13 + $0xe0] sm:$0xff] }
 0x2f4   :  { %1074 = vmatprep.subr.mxu0 %v725_v32  ;;  %1145 = vmatprep.subr.mxu1 %v853_v33  ;;  %v1192_v32 = vld [vmem:[#allocation13 + $0x60] sm:$0xff]  ;;  %v1207_v33 = vld [vmem:[#allocation13 + $0xd8] sm:$0xff] }
 0x2f5   :  { %1075 = vmatpush2.msra.mxu0 %v724_v34  ;;  %1146 = vmatpush2.msra.mxu1 %v852_v35  ;;  %v1191_v34 = vld [vmem:[#allocation13 + $0x58] sm:$0xff]  ;;  %v1242_v35 = vld [vmem:[#allocation13 + $0x1f0] sm:$0xff] }
 0x2f6   :  { %1076 = vmatprep.subr.mxu0 %v721_v37  ;;  %1147 = vmatprep.subr.mxu1 %v849_v39  ;;  %v1205_v37 = vld [vmem:[#allocation13 + $0xc8] sm:$0xff]  ;;  %v1226_v39 = vld [vmem:[#allocation13 + $0x170] sm:$0xff] }
 0x2f7   :  { %1077 = vmatpush2.msra.mxu0 %v720_v40  ;;  %1148 = vmatpush2.msra.mxu1 %v848_v41  ;;  %v1189_v40 = vld [vmem:[#allocation13 + $0x48] sm:$0xff] }
 0x2f8   :  { %1078 = vmatprep.subr.mxu0 %v717_v42  ;;  %1149 = vmatprep.subr.mxu1 %v845_v43  ;;  %v1241_v41 = vld [vmem:[#allocation13 + $0x1e8] sm:$0xff]  ;;  %v1204_v42 = vld [vmem:[#allocation13 + $0xc0] sm:$0xff] }
 0x2f9   :  { %1079 = vmatpush2.msra.mxu0 %v716_v44  ;;  %1150 = vmatpush2.msra.mxu1 %v844_v45  ;;  %v1225_v43 = vld [vmem:[#allocation13 + $0x168] sm:$0xff]  ;;  %v1188_v44 = vld [vmem:[#allocation13 + $0x40] sm:$0xff] }
 0x2fa   :  { %1080 = vmatprep.subr.mxu0 %v713_v46  ;;  %1151 = vmatprep.subr.mxu1 %v841_v47  ;;  %v1240_v45 = vld [vmem:[#allocation13 + $0x1e0] sm:$0xff]  ;;  %v1203_v46 = vld [vmem:[#allocation13 + $0xb8] sm:$0xff] }
 0x2fb   :  { %1081 = vmatpush2.msra.mxu0 %v712_v48  ;;  %1152 = vmatpush2.msra.mxu1 %v840_v49  ;;  %v1224_v47 = vld [vmem:[#allocation13 + $0x160] sm:$0xff]  ;;  %v1187_v48 = vld [vmem:[#allocation13 + $0x38] sm:$0xff] }
 0x2fc   :  { %1082 = vmatprep.subr.mxu0 %v709_v50  ;;  %1153 = vmatprep.subr.mxu1 %v837_v51  ;;  %v1239_v49 = vld [vmem:[#allocation13 + $0x1d8] sm:$0xff]  ;;  %v1202_v50 = vld [vmem:[#allocation13 + $0xb0] sm:$0xff] }
 0x2fd   :  { %1083 = vmatpush2.msra.mxu0 %v708_v52  ;;  %1154 = vmatpush2.msra.mxu1 %v836_v54  ;;  %v1223_v51 = vld [vmem:[#allocation13 + $0x158] sm:$0xff]  ;;  %v1186_v52 = vld [vmem:[#allocation13 + $0x30] sm:$0xff] }
 0x2fe   :  { %1084 = vmatprep.subr.mxu0 %v705_v56  ;;  %1155 = vmatprep.subr.mxu1 %v833_v57  ;;  %v1238_v54 = vld [vmem:[#allocation13 + $0x1d0] sm:$0xff]  ;;  %v1201_v56 = vld [vmem:[#allocation13 + $0xa8] sm:$0xff] }
 0x2ff   :  { %1085 = vmatpush2.msra.mxu0 %v704_v58  ;;  %1156 = vmatpush2.msra.mxu1 %v832_v59  ;;  %v1222_v57 = vld [vmem:[#allocation13 + $0x150] sm:$0xff]  ;;  %v1185_v58 = vld [vmem:[#allocation13 + $0x28] sm:$0xff] }
 0x300   :  { %1086 = vmatprep.subr.mxu0 %v701_v60  ;;  %1157 = vmatprep.subr.mxu1 %v829_v61  ;;  %v1237_v59 = vld [vmem:[#allocation13 + $0x1c8] sm:$0xff]  ;;  %v1200_v60 = vld [vmem:[#allocation13 + $0xa0] sm:$0xff] }
 0x301   :  { %1087 = vmatpush2.msra.mxu0 %v700_v0  ;;  %1158 = vmatpush2.msra.mxu1 %v828_v1  ;;  %v1221_v61 = vld [vmem:[#allocation13 + $0x148] sm:$0xff]  ;;  %v1184_v0 = vld [vmem:[#allocation13 + $0x20] sm:$0xff] }
 0x302   :  { %1088 = vmatprep.subr.mxu0 %v697_v2  ;;  %1159 = vmatprep.subr.mxu1 %v825_v3  ;;  %v1236_v1 = vld [vmem:[#allocation13 + $0x1c0] sm:$0xff]  ;;  %v1199_v2 = vld [vmem:[#allocation13 + $0x98] sm:$0xff] }
 0x303   :  { %1089 = vmatpush2.msra.mxu0 %v696_v4  ;;  %1160 = vmatpush2.msra.mxu1 %v824_v5  ;;  %v1220_v3 = vld [vmem:[#allocation13 + $0x140] sm:$0xff]  ;;  %v1183_v4 = vld [vmem:[#allocation13 + $0x18] sm:$0xff] }
 0x304   :  { %1090 = vmatprep.subr.mxu0 %v693_v9  ;;  %1161 = vmatprep.subr.mxu1 %v821_v10  ;;  %v1235_v5 = vld [vmem:[#allocation13 + $0x1b8] sm:$0xff]  ;;  %v1198_v9 = vld [vmem:[#allocation13 + $0x90] sm:$0xff] }
 0x305   :  { %1091 = vmatpush2.msra.mxu0 %v692_v11  ;;  %1162 = vmatpush2.msra.mxu1 %v820_v12  ;;  %v1219_v10 = vld [vmem:[#allocation13 + $0x138] sm:$0xff]  ;;  %v1182_v11 = vld [vmem:[#allocation13 + $0x10] sm:$0xff] }
 0x306   :  { %1092 = vmatprep.subr.mxu0 %v689_v13  ;;  %1163 = vmatprep.subr.mxu1 %v817_v14  ;;  %v1234_v12 = vld [vmem:[#allocation13 + $0x1b0] sm:$0xff]  ;;  %v1197_v13 = vld [vmem:[#allocation13 + $0x88] sm:$0xff] }
 0x307   :  { %1093 = vmatpush2.msra.mxu0 %v688_v15  ;;  %1164 = vmatpush2.msra.mxu1 %v816_v16  ;;  %v1218_v14 = vld [vmem:[#allocation13 + $0x130] sm:$0xff]  ;;  %v1181_v15 = vld [vmem:[#allocation13 + $0x8] sm:$0xff] }
 0x308   :  { %1094 = vmatprep.subr.mxu0 %v685_v17  ;;  %1165 = vmatprep.subr.mxu1 %v813_v18  ;;  %v1233_v16 = vld [vmem:[#allocation13 + $0x1a8] sm:$0xff]  ;;  %v1196_v17 = vld [vmem:[#allocation13 + $0x80] sm:$0xff] }
 0x309   :  { %1095 = vmatpush2.msra.mxu0 %v684_v19  ;;  %1166 = vmatpush2.msra.mxu1 %v812_v20  ;;  %v1217_v18 = vld [vmem:[#allocation13 + $0x128] sm:$0xff]  ;;  %v1180_v19 = vld [vmem:[#allocation13] sm:$0xff] }
 0x30a   :  { %1096 = vmatprep.subr.mxu0 %v681_v21  ;;  %1167 = vmatprep.subr.mxu1 %v809_v22  ;;  %v1232_v20 = vld [vmem:[#allocation13 + $0x1a0] sm:$0xff]  ;;  %v1231_v22 = vld [vmem:[#allocation13 + $0x198] sm:$0xff] }
 0x30b   :  { %1097 = vmatpush2.msra.mxu0 %v680_v23  ;;  %1168 = vmatpush2.msra.mxu1 %v808_v24  ;;  %v1216_v21 = vld [vmem:[#allocation13 + $0x120] sm:$0xff]  ;;  %v1215_v23 = vld [vmem:[#allocation13 + $0x118] sm:$0xff]  ;;  %v1230_v24 = vld [vmem:[#allocation13 + $0x190] sm:$0xff] }
 0x30c   :  { %1099 = vmatmul.mubr.f32.vlgmr.msra.gmra.mxu0 %v610_v6  ;;  %1170 = vmatmul.mubr.f32.vlgmr.msra.gmra.mxu1 %v612_v8  ;;  %v1190_v6 = vld [vmem:[#allocation13 + $0x50] sm:$0xff]  ;;  %v1227_v8 = vld [vmem:[#allocation13 + $0x178] sm:$0xff] }
 0x30d   :  { %1422 = vmatprep.subr.mxu0 %v1211_v25  ;;  %1457 = vmatprep.subr.mxu1 %v1243_v63  ;;  %v1214_v25 = vld [vmem:[#allocation13 + $0x110] sm:$0xff] }
 0x30e   :  { %1423 = vmatpush3.msra.mxu0 %v1195_v26  ;;  %1458 = vmatpush3.msra.mxu1 %v1227_v8  ;;  %v1229_v26 = vld [vmem:[#allocation13 + $0x188] sm:$0xff] }
 0x30f   :  { %1424 = vmatprep.subr.mxu0 %v1210_v27  ;;  %1459 = vmatprep.subr.mxu1 %v1242_v35  ;;  %v1213_v27 = vld [vmem:[#allocation13 + $0x108] sm:$0xff] }
 0x310   :  { %1425 = vmatpush3.msra.mxu0 %v1194_v28  ;;  %1460 = vmatpush3.msra.mxu1 %v1226_v39  ;;  %v1228_v28 = vld [vmem:[#allocation13 + $0x180] sm:$0xff] }
 0x311   :  { %1426 = vmatprep.subr.mxu0 %v1209_v29  ;;  %1461 = vmatprep.subr.mxu1 %v1241_v41  ;;  %v1212_v29 = vld [vmem:[#allocation13 + $0x100] sm:$0xff] }
 0x312   :  { %1427 = vmatpush3.msra.mxu0 %v1193_v30  ;;  %1462 = vmatpush3.msra.mxu1 %v1225_v43  ;;  %v870_v30 = vld [vmem:[%s1867_s7] sm:$0xf] }
 0x313   :  { %1428 = vmatprep.subr.mxu0 %v1208_v31  ;;  %1463 = vmatprep.subr.mxu1 %v1240_v45  ;;  %v875_v31 = vrot.slane %v870_v30, %v1813_v36  ;;  %v883_v41 = vrot.slane %v870_v30, %v458_v53  ;;  %v887_v36 = vrot.slane %v870_v30, %v462_v55 }
 0x314   :  { %1429 = vmatpush3.msra.mxu0 %v1192_v32  ;;  %1464 = vmatpush3.msra.mxu1 %v1224_v47  ;;  %v879_v32 = vrot.slane %v870_v30, %v1816_v38 }
 0x315   :  { %1430 = vmatprep.subr.mxu0 %v1207_v33  ;;  %1465 = vmatprep.subr.mxu1 %v1239_v49 }
 0x316   :  { %1431 = vmatpush3.msra.mxu0 %v1191_v34  ;;  %1466 = vmatpush3.msra.mxu1 %v1223_v51 }
 0x317   :  { %1432 = vmatprep.subr.mxu0 %v1206_v62  ;;  %1467 = vmatprep.subr.mxu1 %v1238_v54 }
 0x318   :  { %1433 = vmatpush3.msra.mxu0 %v1190_v6  ;;  %1468 = vmatpush3.msra.mxu1 %v1222_v57 }
 0x319   :  { %1434 = vmatprep.subr.mxu0 %v1205_v37  ;;  %1469 = vmatprep.subr.mxu1 %v1237_v59 }
 0x31a   :  { %1435 = vmatpush3.msra.mxu0 %v1189_v40  ;;  %1470 = vmatpush3.msra.mxu1 %v1221_v61 }
 0x31b   :  { %1436 = vmatprep.subr.mxu0 %v1204_v42  ;;  %1471 = vmatprep.subr.mxu1 %v1236_v1 }
 0x31c   :  { %1437 = vmatpush3.msra.mxu0 %v1188_v44  ;;  %1472 = vmatpush3.msra.mxu1 %v1220_v3 }
 0x31d   :  { %1438 = vmatprep.subr.mxu0 %v1203_v46  ;;  %1473 = vmatprep.subr.mxu1 %v1235_v5 }
 0x31e   :  { %1439 = vmatpush3.msra.mxu0 %v1187_v48  ;;  %1474 = vmatpush3.msra.mxu1 %v1219_v10 }
 0x31f   :  { %1440 = vmatprep.subr.mxu0 %v1202_v50  ;;  %1475 = vmatprep.subr.mxu1 %v1234_v12 }
 0x320   :  { %1441 = vmatpush3.msra.mxu0 %v1186_v52  ;;  %1476 = vmatpush3.msra.mxu1 %v1218_v14 }
 0x321   :  { %1442 = vmatprep.subr.mxu0 %v1201_v56  ;;  %1477 = vmatprep.subr.mxu1 %v1233_v16 }
 0x322   :  { %1443 = vmatpush3.msra.mxu0 %v1185_v58  ;;  %1478 = vmatpush3.msra.mxu1 %v1217_v18 }
 0x323   :  { %1444 = vmatprep.subr.mxu0 %v1200_v60  ;;  %1479 = vmatprep.subr.mxu1 %v1232_v20 }
 0x324   :  { %1445 = vmatpush3.msra.mxu0 %v1184_v0  ;;  %1480 = vmatpush3.msra.mxu1 %v1216_v21 }
 0x325   :  { %1446 = vmatprep.subr.mxu0 %v1199_v2  ;;  %1481 = vmatprep.subr.mxu1 %v1231_v22 }
 0x326   :  { %1447 = vmatpush3.msra.mxu0 %v1183_v4  ;;  %1482 = vmatpush3.msra.mxu1 %v1215_v23 }
 0x327   :  { %1448 = vmatprep.subr.mxu0 %v1198_v9  ;;  %1483 = vmatprep.subr.mxu1 %v1230_v24 }
 0x328   :  { %1449 = vmatpush3.msra.mxu0 %v1182_v11  ;;  %1484 = vmatpush3.msra.mxu1 %v1214_v25 }
 0x329   :  { %1450 = vmatprep.subr.mxu0 %v1197_v13  ;;  %1485 = vmatprep.subr.mxu1 %v1229_v26 }
 0x32a   :  { %1451 = vmatpush3.msra.mxu0 %v1181_v15  ;;  %1486 = vmatpush3.msra.mxu1 %v1213_v27 }
 0x32b   :  { %1452 = vmatprep.subr.mxu0 %v1196_v17  ;;  %1487 = vmatprep.subr.mxu1 %v1228_v28 }
 0x32c   :  { %1453 = vmatpush3.msra.mxu0 %v1180_v19  ;;  %1488 = vmatpush3.msra.mxu1 %v1212_v29 }
 0x38b   :  { %v958_v33 = vpop.f32.mrf.mxu0  ;;  %v1029_v34 = vpop.f32.mrf.mxu1 }
 0x38c   :  { %v959_v62 = vadd.f32 %v958_v33, %v875_v31 }
 0x38d   :  { %v960_v6 = vpop.f32.mrf.mxu0  ;;  %v1031_v35 = vpop.f32.mrf.mxu1 }
 0x38e   :  { %v961_v63 = vadd.f32 %v960_v6, %v879_v32  ;;  %v1030_v8 = vadd.f32 %v1029_v34, %v959_v62 }
 0x390   :  { %v1032_v37 = vadd.f32 %v1031_v35, %v961_v63  ;;  %v1176_v40 = vmax.f32 %v1030_v8, 0.0 }
 0x392   :  { %v1177_v39 = vmax.f32 %v1032_v37, 0.0 }
 0x394   :  { %1315 = vmatprep.mubr.f32.mxu0 %v1177_v39 }
 0x395   :  { %1316 = vmatmul.mubr.f32.vlgmr.msra.gmra.mxu0 %v1176_v40 }
 0x3cc   :  { %v1100_v42 = vpop.f32.mrf.mxu0  ;;  %v1171_v38 = vpop.f32.mrf.mxu1 }
 0x3cd   :  { %v1101_v43 = vadd.f32 %v1100_v42, %v883_v41 }
 0x3ce   :  { %v1102_v44 = vpop.f32.mrf.mxu0  ;;  %v1173_v47 = vpop.f32.mrf.mxu1 }
 0x3cf   :  { %v1103_v45 = vadd.f32 %v1102_v44, %v887_v36  ;;  %v1172_v46 = vadd.f32 %v1171_v38, %v1101_v43 }
 0x3d1   :  { %v1174_v48 = vadd.f32 %v1173_v47, %v1103_v45  ;;  %v1178_v50 = vmax.f32 %v1172_v46, 0.0 }
 0x3d3   :  { %v1179_v49 = vmax.f32 %v1174_v48, 0.0 }
 0x3d5   :  { %1385 = vmatprep.mubr.f32.mxu1 %v1179_v49 }
 0x3d6   :  { %1386 = vmatmul.mubr.f32.vlgmr.msra.gmra.mxu1 %v1178_v50 }
 0x455   :  { %v1454_v51 = vpop.f32.mrf.mxu0 }
 0x457   :  { %v1455_v52 = vpop.f32.mrf.mxu0 }
 0x458   :  { %v1456_v54 = vadd.f32 %v1455_v52, %v1454_v51 }
 0x45a   :  { %v1318_v56 = vadd.f32 %v1456_v54, %v1412_v7 }
 0x496   :  { %v1489_v53 = vpop.f32.mrf.mxu1 }
 0x498   :  { %v1490_v55 = vpop.f32.mrf.mxu1 }
 0x499   :  { %v1491_v57 = vadd.f32 %v1490_v55, %v1489_v53 }
 0x49b   :  { %v1388_v58 = vadd.f32 %v1491_v57, %v1318_v56 }
 0x49d   :  { %1391 = vst [vmem:[#allocation14] sm:$0xff] %v1388_v58 }
 0x49e   :  { %1680 = shalt.err (!%p1677_p11)
}
 0x49f   :  { %1401 = dma.vmem_to_hbm [thread:$0]  %s1399_s30, 128, %s1870_s10, [#allocation4]  }
 0x4a0   :  { %1697 = dma.done.wait [#allocation4], 128  }
 0x4a1   :  { %1698 = vsyncadd [#allocation4], 4294967168 }
 0x4a2   :  { %1405 = vsyncpa [#allocation3], 1 }
 0x4a3   :  { %1406 = vsyncpa [#allocation6], 1 }
 0x4a4   :  { %1407 = vsyncpa [#allocation9], 1 }
 0x4a5   :  { %1408 = vsyncpa [#allocation12], 1 }
 0x4a6   :  { %1409 = vsyncpa [#allocation4], 1 }

</bundles_post_ra>
